<compile_context>
chip_gen: v7x
topology: tpu7x:2x2x1
jax: 0.10.0
libtpu: 0.0.40
codegen_flags: <defaults>
</compile_context>

<pallas_src>
import functools

import jax
import jax.numpy as jnp
from jax import lax
from jax.experimental import pallas as pl
from jax.experimental.pallas import tpu as pltpu


def _round_up(x, m):
    return (x + m - 1) // m * m


def _vmem_limit(block_bytes):
    # double-buffered pipeline footprint (+headroom), clamped to sane bounds
    return int(min(64 * 2 ** 20, max(4 * 2 ** 20, 4 * int(block_bytes))))


# ----------------------------- Pallas kernels ------------------------------ #

def _mm_bias_kernel(x_ref, w_ref, b_ref, o_ref, *, relu):
    """MXU matmul + bias (+ReLU).  Used for the stride-2 conv1 (no shortcut)."""
    y = jnp.dot(x_ref[...], w_ref[...], preferred_element_type=jnp.float32) + b_ref[...]
    if relu:
        y = jnp.maximum(y, 0.0)
    o_ref[...] = y.astype(o_ref.dtype)


def _mm_dual_kernel(x_ref, w_ref, b1_ref, b2_ref, o1_ref, o2_ref, *, cout):
    """One (K, 2*cout) matmul producing conv1 (+ReLU) and the 1x1 shortcut."""
    y = jnp.dot(x_ref[...], w_ref[...], preferred_element_type=jnp.float32)
    y1 = jnp.maximum(y[:, :cout] + b1_ref[...], 0.0)   # conv1: BN + ReLU
    y2 = y[:, cout:] + b2_ref[...]                     # shortcut: BN only
    o1_ref[...] = y1.astype(o1_ref.dtype)
    o2_ref[...] = y2.astype(o2_ref.dtype)


def _conv3x3_body(x_ref, w_ref, *, th, wo, cin, cout):
    """Fused in-kernel im2col: 9 shifted-window bf16 dots, f32 accumulation."""
    row0 = pl.program_id(1) * th
    acc = jnp.zeros((th * wo, cout), jnp.float32)
    for dy in range(3):
        rows = x_ref[0, pl.ds(row0 + dy, th), :, :]          # (th, wo+2, cin)
        for dx in range(3):
            win = rows[:, dx:dx + wo, :].reshape(th * wo, cin)
            acc = acc + jnp.dot(win, w_ref[dy * 3 + dx],
                                preferred_element_type=jnp.float32)
    return acc


def _conv3x3_kernel(x_ref, w_ref, b_ref, o_ref, *, th, wo, cin, cout, relu):
    y = _conv3x3_body(x_ref, w_ref, th=th, wo=wo, cin=cin, cout=cout) + b_ref[...]
    if relu:
        y = jnp.maximum(y, 0.0)
    o_ref[0] = y.reshape(th, wo, cout).astype(o_ref.dtype)


def _conv3x3_res_kernel(x_ref, w_ref, b_ref, r_ref, o_ref, *, th, wo, cin, cout,
                        relu_before_add, relu_after_add):
    y = _conv3x3_body(x_ref, w_ref, th=th, wo=wo, cin=cin, cout=cout) + b_ref[...]
    if relu_before_add:
        y = jnp.maximum(y, 0.0)
    y = y + r_ref[0].reshape(th * wo, cout).astype(jnp.float32)
    if relu_after_add:
        y = jnp.maximum(y, 0.0)
    o_ref[0] = y.reshape(th, wo, cout).astype(o_ref.dtype)


# ----------------------------- tiling helpers ------------------------------ #

def _row_tiling(m, cap=1024):
    """Row tile (multiple of 8) that divides m (no pad) and gives >=2 grid steps."""
    cands = [t for t in range(8, min(m, cap) + 1, 8) if m % t == 0]
    multi = [t for t in cands if m // t >= 2]
    if multi:
        tile = max(multi)
    elif cands:
        tile = max(cands)
    else:
        tile = min(cap, _round_up(m, 8))
    return tile, _round_up(m, tile)


def _pick_tile_h(n, ho, wo):
    """Output-row tile: divides ho, <=~2048 px/step, >=4 total grid steps if possible."""
    divisors = [d for d in range(1, ho + 1) if ho % d == 0]
    th = 1
    for d in divisors:
        if d * wo <= 2048:
            th = d
    if n * (ho // th) < 4:
        for d in sorted(divisors, reverse=True):
            if n * (ho // d) >= 4:
                th = d
                break
    return th


# ----------------------------- Pallas wrappers ----------------------------- #

def conv1_dual(cols, w_cat, b1, b2, *, out_dtype=jnp.bfloat16):
    """conv1 + fused 1x1 shortcut: one matmul, two outputs. cols:(M,K) bf16."""
    m, k = cols.shape
    cout = w_cat.shape[1] // 2
    tile, m_pad = _row_tiling(m)
    if m_pad != m:                       # generic fallback; not hit for even H/W
        cols = jnp.pad(cols, ((0, m_pad - m), (0, 0)))
    grid = (m_pad // tile,)
    cspec = pl.BlockSpec((tile, k), lambda i: (i, 0))
    wspec = pl.BlockSpec(tuple(w_cat.shape), lambda i: (0, 0))
    bspec = pl.BlockSpec((1, cout), lambda i: (0, 0))
    ospec = pl.BlockSpec((tile, cout), lambda i: (i, 0))
    blk = tile * k * 2 + w_cat.size * 2 + 2 * cout * 4 + 2 * tile * cout * 2
    t1, sc = pl.pallas_call(
        functools.partial(_mm_dual_kernel, cout=cout),
        grid=grid,
        in_specs=[cspec, wspec, bspec, bspec],
        out_specs=(ospec, ospec),
        out_shape=(jax.ShapeDtypeStruct((m_pad, cout), out_dtype),
                   jax.ShapeDtypeStruct((m_pad, cout), out_dtype)),
        compiler_params=pltpu.CompilerParams(
            dimension_semantics=("parallel",), vmem_limit_bytes=_vmem_limit(blk)),
    )(cols, w_cat, b1, b2)
    return t1[:m], sc[:m]


def conv1_single(cols, w, b, *, relu=True, out_dtype=jnp.bfloat16):
    m, k = cols.shape
    cout = w.shape[1]
    tile, m_pad = _row_tiling(m)
    if m_pad != m:
        cols = jnp.pad(cols, ((0, m_pad - m), (0, 0)))
    grid = (m_pad // tile,)
    blk = tile * k * 2 + w.size * 2 + cout * 4 + tile * cout * 2
    y = pl.pallas_call(
        functools.partial(_mm_bias_kernel, relu=relu),
        grid=grid,
        in_specs=[pl.BlockSpec((tile, k), lambda i: (i, 0)),
                  pl.BlockSpec(tuple(w.shape), lambda i: (0, 0)),
                  pl.BlockSpec((1, cout), lambda i: (0, 0))],
        out_specs=pl.BlockSpec((tile, cout), lambda i: (i, 0)),
        out_shape=jax.ShapeDtypeStruct((m_pad, cout), out_dtype),
        compiler_params=pltpu.CompilerParams(
            dimension_semantics=("parallel",), vmem_limit_bytes=_vmem_limit(blk)),
    )(cols, w, b)
    return y[:m]


def fused_conv3x3_s1(x, w9, bias, *, residual=None, relu=False,
                     relu_before_add=False, relu_after_add=False,
                     out_dtype=jnp.bfloat16):
    """3x3 stride-1 pad-1 conv + folded-BN bias (+residual) (+ReLU), fully fused.

    x: (N,H,W,Cin) bf16;  w9: (9,Cin,Cout) bf16 (BN folded);  bias: (1,Cout) f32;
    residual: (N,H,W,Cout) bf16 or None.  The padded image of one batch is the
    constant-per-batch input block (DMA'd once per batch); im2col is in-kernel.
    """
    n, h, w, cin = x.shape
    cout = w9.shape[-1]
    th = _pick_tile_h(n, h, w)
    xp = jnp.pad(x, ((0, 0), (1, 1), (1, 1), (0, 0)))
    grid = (n, h // th)

    x_spec = pl.BlockSpec((1, h + 2, w + 2, cin), lambda b, r: (b, 0, 0, 0))
    w_spec = pl.BlockSpec((9, cin, cout), lambda b, r: (0, 0, 0))
    b_spec = pl.BlockSpec((1, cout), lambda b, r: (0, 0))
    o_spec = pl.BlockSpec((1, th, w, cout), lambda b, r: (b, r, 0, 0))
    out_shape = jax.ShapeDtypeStruct((n, h, w, cout), out_dtype)

    out_isz = jnp.dtype(out_dtype).itemsize
    blk = ((h + 2) * (w + 2) * cin * 2 + 9 * cin * cout * 2 + cout * 4
           + th * w * cout * out_isz
           + (th * w * cout * 2 if residual is not None else 0))
    cp = pltpu.CompilerParams(dimension_semantics=("parallel", "parallel"),
                              vmem_limit_bytes=_vmem_limit(blk))

    if residual is None:
        kern = functools.partial(_conv3x3_kernel, th=th, wo=w, cin=cin,
                                 cout=cout, relu=relu)
        return pl.pallas_call(kern, grid=grid,
                              in_specs=[x_spec, w_spec, b_spec],
                              out_specs=o_spec, out_shape=out_shape,
                              compiler_params=cp)(xp, w9, bias)
    kern = functools.partial(_conv3x3_res_kernel, th=th, wo=w, cin=cin, cout=cout,
                             relu_before_add=relu_before_add,
                             relu_after_add=relu_after_add)
    return pl.pallas_call(kern, grid=grid,
                          in_specs=[x_spec, w_spec, b_spec, o_spec],
                          out_specs=o_spec, out_shape=out_shape,
                          compiler_params=cp)(xp, w9, bias, residual)


# ------------------------------ JAX glue ----------------------------------- #

def _im2col_3x3(x, stride):
    """x:(N,H,W,C) bf16, 3x3 pad=1 -> (N*Ho*Wo, 9*C), taps ordered (kh,kw,ci)."""
    n, h, w, c = x.shape
    ho = (h + 2 - 3) // stride + 1
    wo = (w + 2 - 3) // stride + 1
    xp = jnp.pad(x, ((0, 0), (1, 1), (1, 1), (0, 0)))
    cols = []
    for dy in range(3):
        for dx in range(3):
            t = xp[:, dy:dy + stride * (ho - 1) + 1:stride,
                      dx:dx + stride * (wo - 1) + 1:stride, :]
            cols.append(t.reshape(n * ho * wo, c))
    return jnp.concatenate(cols, axis=-1), (n, ho, wo)


def _bn_params(key, c, eps=1e-5):
    kg, kb, km, kv = jax.random.split(key, 4)
    gamma = jax.random.uniform(kg, (c,), jnp.float32, 0.5, 1.5)
    beta = jax.random.normal(kb, (c,), jnp.float32) * 0.1
    mean = jax.random.normal(km, (c,), jnp.float32) * 0.1
    var = jax.random.uniform(kv, (c,), jnp.float32, 0.5, 1.5)
    scale = gamma / jnp.sqrt(var + eps)
    bias = beta - mean * scale
    return scale, bias


def init_params(key, in_chans, out_chans):
    ks = jax.random.split(key, 10)

    def conv_w(k, kh, kw, ci, co):  # HWIO flattened to (kh*kw*ci, co)
        return (jax.random.normal(k, (kh, kw, ci, co), jnp.float32) * 0.1
                ).reshape(kh * kw * ci, co)

    has_sc = in_chans != out_chans
    return {
        "w1": conv_w(ks[0], 3, 3, in_chans, out_chans), "bn1": _bn_params(ks[1], out_chans),
        "w2": conv_w(ks[2], 3, 3, out_chans, out_chans), "bn2": _bn_params(ks[3], out_chans),
        "ws": conv_w(ks[4], 1, 1, in_chans, out_chans) if has_sc else None,
        "bns": _bn_params(ks[5], out_chans) if has_sc else None,
        "w3": conv_w(ks[6], 3, 3, out_chans, out_chans), "bn3": _bn_params(ks[7], out_chans),
        "w4": conv_w(ks[8], 3, 3, out_chans, out_chans), "bn4": _bn_params(ks[9], out_chans),
    }


def _fold(w_flat, bn):
    scale, bias = bn
    return w_flat * scale[None, :], bias


def _prep_conv9(w_flat, bn):
    """Fold BN scale; reshape flat (9*ci, co) weight to per-tap (9, ci, co) bf16."""
    wf, bias = _fold(w_flat, bn)
    co = wf.shape[1]
    ci = wf.shape[0] // 9
    return (wf.reshape(9, ci, co).astype(jnp.bfloat16),
            bias.reshape(1, co).astype(jnp.float32))


def _prep_conv_flat(w_flat, bn):
    wf, bias = _fold(w_flat, bn)
    co = wf.shape[1]
    return wf.astype(jnp.bfloat16), bias.reshape(1, co).astype(jnp.float32)


def _prep_conv1_dual(w1_flat, bn1, ws_flat, bns, cin):
    """Embed the 1x1 stride-2 shortcut at the centre tap of the stride-2 pad-1
    3x3 im2col (valid exactly for that conv1 config) and concatenate along N so
    one matmul produces both outputs."""
    w1f, b1 = _fold(w1_flat, bn1)
    wsf, bs = _fold(ws_flat, bns)
    k, co = w1f.shape
    assert k == 9 * cin, "shortcut embedding requires a 3x3/pad=1/stride=2 conv1"
    ws_emb = jnp.zeros((k, co), jnp.float32).at[4 * cin:5 * cin, :].set(wsf)
    w_cat = jnp.concatenate([w1f, ws_emb], axis=1).astype(jnp.bfloat16)  # (k, 2co)
    return (w_cat, b1.reshape(1, co).astype(jnp.float32),
            bs.reshape(1, co).astype(jnp.float32))


def linknet_encoder_forward(x_nchw, params):
    x = jnp.transpose(x_nchw, (0, 2, 3, 1)).astype(jnp.bfloat16)   # NCHW -> NHWC bf16
    n, h, w, cin = x.shape
    cout = params["w1"].shape[1]
    has_sc = params["ws"] is not None

    w2, b2 = _prep_conv9(params["w2"], params["bn2"])
    w3, b3 = _prep_conv9(params["w3"], params["bn3"])
    w4, b4 = _prep_conv9(params["w4"], params["bn4"])

    # stage1[0:3]: conv3x3 s2 -> BN -> ReLU   (+ fused 1x1 s2 shortcut -> BN)
    cols1, (_, ho, wo) = _im2col_3x3(x, stride=2)
    if has_sc:
        w_cat, b1, bs = _prep_conv1_dual(params["w1"], params["bn1"],
                                         params["ws"], params["bns"], cin)
        t1_flat, sc_flat = conv1_dual(cols1, w_cat, b1, bs)
        sc = sc_flat.reshape(n, ho, wo, cout)
    else:
        w1, b1 = _prep_conv_flat(params["w1"], params["bn1"])
        t1_flat = conv1_single(cols1, w1, b1, relu=True)
        sc = None
    t1 = t1_flat.reshape(n, ho, wo, cout)

    # stage1[3:]: conv3x3 s1 -> BN, (+ shortcut), ReLU     [fused halo kernel]
    if sc is not None:
        out = fused_conv3x3_s1(t1, w2, b2, residual=sc,
                               relu_before_add=False, relu_after_add=True)
    else:
        out = fused_conv3x3_s1(t1, w2, b2, relu=True)

    # stage2: conv -> BN -> ReLU -> conv -> BN -> ReLU, then + out
    t3 = fused_conv3x3_s1(out, w3, b3, relu=True)
    y = fused_conv3x3_s1(t3, w4, b4, residual=out,
                         relu_before_add=True, relu_after_add=False,
                         out_dtype=jnp.float32)
    return jnp.transpose(y, (0, 3, 1, 2))                          # -> NCHW f32


# --------------------------- pure-JAX reference ----------------------------- #
# Mirrors the kernel path's quantization points (bf16 weights/activations,
# f32 accumulation & bias) so differences are accumulation-order only.

def linknet_encoder_reference(x_nchw, params):
    def conv(x, w_flat, kh, kw, stride, bn, relu):
        scale, bias = bn
        ci = w_flat.shape[0] // (kh * kw)
        co = w_flat.shape[1]
        w = (w_flat * scale[None, :]).astype(jnp.bfloat16).reshape(kh, kw, ci, co)
        pad = (kh - 1) // 2
        y = lax.conv_general_dilated(
            x.astype(jnp.bfloat16), w, (stride, stride), ((pad, pad), (pad, pad)),
            dimension_numbers=("NHWC", "HWIO", "NHWC"),
            preferred_element_type=jnp.float32)
        y = y + bias.reshape(1, 1, 1, co)
        if relu:
            y = jnp.maximum(y, 0.0)
        return y

    x = jnp.transpose(x_nchw, (0, 2, 3, 1)).astype(jnp.bfloat16)
    t1 = conv(x, params["w1"], 3, 3, 2, params["bn1"], relu=True).astype(jnp.bfloat16)
    t2 = conv(t1, params["w2"], 3, 3, 1, params["bn2"], relu=False)
    if params["ws"] is not None:
        sc = conv(x, params["ws"], 1, 1, 2, params["bns"], relu=False).astype(jnp.bfloat16)
        t2 = t2 + sc.astype(jnp.float32)
    out = jnp.maximum(t2, 0.0).astype(jnp.bfloat16)
    s1 = conv(out, params["w3"], 3, 3, 1, params["bn3"], relu=True).astype(jnp.bfloat16)
    s2 = jnp.maximum(conv(s1, params["w4"], 3, 3, 1, params["bn4"], relu=False), 0.0)
    y = s2 + out.astype(jnp.float32)
    return jnp.transpose(y, (0, 3, 1, 2))


# ---------------------------------- main ------------------------------------ #

if __name__ == "__main__":
    key = jax.random.PRNGKey(0)
    kx, kp = jax.random.split(key)
    N, IN_CHANS, OUT_CHANS, H, W = 2, 4, 32, 16, 16

    x = jax.random.normal(kx, (N, IN_CHANS, H, W), jnp.float32)
    params = init_params(kp, IN_CHANS, OUT_CHANS)

    fwd = jax.jit(linknet_encoder_forward)
    ref = jax.jit(linknet_encoder_reference)

    y = jax.block_until_ready(fwd(x, params))
    y_ref = jax.block_until_ready(ref(x, params))

    assert y.shape == (N, OUT_CHANS, H // 2, W // 2), y.shape
    max_err = float(jnp.max(jnp.abs(y - y_ref)))
    assert max_err < 5e-2, f"max abs err {max_err}"
    print("KERNEL_OK")
</pallas_src>

<mosaic_0001>
module attributes {stable_mosaic.version = 11 : i64} {
  func.func @_mm_dual_kernel(%arg0: i32, %arg1: memref<64x36xbf16, #tpu.memory_space<vmem>>, %arg2: memref<36x64xbf16, #tpu.memory_space<vmem>>, %arg3: memref<1x32xf32, #tpu.memory_space<vmem>>, %arg4: memref<1x32xf32, #tpu.memory_space<vmem>>, %arg5: memref<64x32xbf16, #tpu.memory_space<vmem>>, %arg6: memref<64x32xbf16, #tpu.memory_space<vmem>>) attributes {dimension_semantics = [#tpu.dimension_semantics<parallel>], iteration_bounds = array<i64: 2>, scalar_prefetch = 0 : i64, scratch_operands = 0 : i64, tpu.core_type = #tpu.core_type<tc>, window_params = [{transform_indices = @transform_0, window_bounds = array<i64: 64, 36>}, {pipeline_mode = #tpu.pipeline_mode<synchronous>, transform_indices = @transform_1, window_bounds = array<i64: 36, 64>}, {pipeline_mode = #tpu.pipeline_mode<synchronous>, transform_indices = @transform_2, window_bounds = array<i64: 1, 32>}, {pipeline_mode = #tpu.pipeline_mode<synchronous>, transform_indices = @transform_3, window_bounds = array<i64: 1, 32>}, {transform_indices = @transform_4, window_bounds = array<i64: 64, 32>}, {transform_indices = @transform_5, window_bounds = array<i64: 64, 32>}]} {
    %c0 = arith.constant 0 : index
    %c0_0 = arith.constant 0 : index
    %0 = vector.load %arg1[%c0, %c0_0] : memref<64x36xbf16, #tpu.memory_space<vmem>>, vector<64x36xbf16>
    %c0_1 = arith.constant 0 : index
    %c0_2 = arith.constant 0 : index
    %1 = vector.load %arg2[%c0_1, %c0_2] : memref<36x64xbf16, #tpu.memory_space<vmem>>, vector<36x64xbf16>
    %cst = arith.constant dense<0.000000e+00> : vector<64x64xf32>
    %2 = tpu.matmul %0, %1, %cst {dimension_numbers = #tpu.dot_dimension_numbers<[1], [0], [0], [1], [0, 0, 1, 1], [], []>} : vector<64x36xbf16>, vector<36x64xbf16>, vector<64x64xf32> -> vector<64x64xf32>
    %3 = vector.extract_strided_slice %2 {offsets = [0, 0], sizes = [64, 32], strides = [1, 1]} : vector<64x64xf32> to vector<64x32xf32>
    %c0_3 = arith.constant 0 : index
    %c0_4 = arith.constant 0 : index
    %4 = vector.load %arg3[%c0_3, %c0_4] : memref<1x32xf32, #tpu.memory_space<vmem>>, vector<1x32xf32>
    %5 = vector.broadcast %4 : vector<1x32xf32> to vector<64x32xf32>
    %6 = arith.addf %3, %5 : vector<64x32xf32>
    %cst_5 = arith.constant 0.000000e+00 : f32
    %7 = vector.broadcast %cst_5 : f32 to vector<64x32xf32>
    %8 = arith.maximumf %6, %7 : vector<64x32xf32>
    %9 = vector.extract_strided_slice %2 {offsets = [0, 32], sizes = [64, 32], strides = [1, 1]} : vector<64x64xf32> to vector<64x32xf32>
    %c0_6 = arith.constant 0 : index
    %c0_7 = arith.constant 0 : index
    %10 = vector.load %arg4[%c0_6, %c0_7] : memref<1x32xf32, #tpu.memory_space<vmem>>, vector<1x32xf32>
    %11 = vector.broadcast %10 : vector<1x32xf32> to vector<64x32xf32>
    %12 = arith.addf %9, %11 : vector<64x32xf32>
    %13 = arith.truncf %8 : vector<64x32xf32> to vector<64x32xbf16>
    %c0_8 = arith.constant 0 : index
    %c0_9 = arith.constant 0 : index
    %14 = vector.load %arg5[%c0_8, %c0_9] : memref<64x32xbf16, #tpu.memory_space<vmem>>, vector<64x32xbf16>
    tpu.vector_store %arg5[%c0_8, %c0_9], %13 {strides = array<i32>} : memref<64x32xbf16, #tpu.memory_space<vmem>>, vector<64x32xbf16>,
    %15 = arith.truncf %12 : vector<64x32xf32> to vector<64x32xbf16>
    %c0_10 = arith.constant 0 : index
    %c0_11 = arith.constant 0 : index
    %16 = vector.load %arg6[%c0_10, %c0_11] : memref<64x32xbf16, #tpu.memory_space<vmem>>, vector<64x32xbf16>
    tpu.vector_store %arg6[%c0_10, %c0_11], %15 {strides = array<i32>} : memref<64x32xbf16, #tpu.memory_space<vmem>>, vector<64x32xbf16>,
    return
  }
  func.func @transform_0(%arg0: i32) -> (i32, i32) {
    %c0_i32 = arith.constant 0 : i32
    %c0_i32_0 = arith.constant 0 : i32
    return %arg0, %c0_i32 : i32, i32
  }
  func.func @transform_1(%arg0: i32) -> (i32, i32) {
    %c0_i32 = arith.constant 0 : i32
    %c0_i32_0 = arith.constant 0 : i32
    %c0_i32_1 = arith.constant 0 : i32
    return %c0_i32, %c0_i32_0 : i32, i32
  }
  func.func @transform_2(%arg0: i32) -> (i32, i32) {
    %c0_i32 = arith.constant 0 : i32
    %c0_i32_0 = arith.constant 0 : i32
    %c0_i32_1 = arith.constant 0 : i32
    return %c0_i32, %c0_i32_0 : i32, i32
  }
  func.func @transform_3(%arg0: i32) -> (i32, i32) {
    %c0_i32 = arith.constant 0 : i32
    %c0_i32_0 = arith.constant 0 : i32
    %c0_i32_1 = arith.constant 0 : i32
    return %c0_i32, %c0_i32_0 : i32, i32
  }
  func.func @transform_4(%arg0: i32) -> (i32, i32) {
    %c0_i32 = arith.constant 0 : i32
    %c0_i32_0 = arith.constant 0 : i32
    return %arg0, %c0_i32 : i32, i32
  }
  func.func @transform_5(%arg0: i32) -> (i32, i32) {
    %c0_i32 = arith.constant 0 : i32
    %c0_i32_0 = arith.constant 0 : i32
    return %arg0, %c0_i32 : i32, i32
  }
}

module attributes {stable_mosaic.version = 11 : i64} {
  func.func @_conv3x3_kernel(%arg0: i32, %arg1: i32, %arg2: memref<1x10x10x32xbf16, #tpu.memory_space<vmem>>, %arg3: memref<9x32x32xbf16, #tpu.memory_space<vmem>>, %arg4: memref<1x32xf32, #tpu.memory_space<vmem>>, %arg5: memref<1x4x8x32xbf16, #tpu.memory_space<vmem>>) attributes {dimension_semantics = [#tpu.dimension_semantics<parallel>, #tpu.dimension_semantics<parallel>], iteration_bounds = array<i64: 2, 2>, scalar_prefetch = 0 : i64, scratch_operands = 0 : i64, tpu.core_type = #tpu.core_type<tc>, window_params = [{transform_indices = @transform_0, window_bounds = array<i64: 1, 10, 10, 32>}, {pipeline_mode = #tpu.pipeline_mode<synchronous>, transform_indices = @transform_1, window_bounds = array<i64: 9, 32, 32>}, {pipeline_mode = #tpu.pipeline_mode<synchronous>, transform_indices = @transform_2, window_bounds = array<i64: 1, 32>}, {transform_indices = @transform_3, window_bounds = array<i64: 1, 4, 8, 32>}]} {
    %c4_i32 = arith.constant 4 : i32
    %0 = arith.muli %arg1, %c4_i32 : i32
    %cst = arith.constant 0.000000e+00 : f32
    %1 = vector.broadcast %cst : f32 to vector<32x32xf32>
    %c0_i32 = arith.constant 0 : i32
    %2 = arith.addi %0, %c0_i32 : i32
    %c0 = arith.constant 0 : index
    %3 = arith.index_cast %2 : i32 to index
    %c0_0 = arith.constant 0 : index
    %c0_1 = arith.constant 0 : index
    %4 = vector.load %arg2[%c0, %3, %c0_0, %c0_1] : memref<1x10x10x32xbf16, #tpu.memory_space<vmem>>, vector<1x4x10x32xbf16>
    %5 = vector.shape_cast %4 : vector<1x4x10x32xbf16> to vector<4x10x32xbf16>
    %6 = vector.extract_strided_slice %5 {offsets = [0, 0, 0], sizes = [4, 8, 32], strides = [1, 1, 1]} : vector<4x10x32xbf16> to vector<4x8x32xbf16>
    %7 = vector.shape_cast %6 : vector<4x8x32xbf16> to vector<32x32xbf16>
    %c0_2 = arith.constant 0 : index
    %c0_3 = arith.constant 0 : index
    %c0_4 = arith.constant 0 : index
    %8 = vector.load %arg3[%c0_2, %c0_3, %c0_4] : memref<9x32x32xbf16, #tpu.memory_space<vmem>>, vector<1x32x32xbf16>
    %9 = vector.shape_cast %8 : vector<1x32x32xbf16> to vector<32x32xbf16>
    %cst_5 = arith.constant dense<0.000000e+00> : vector<32x32xf32>
    %10 = tpu.matmul %7, %9, %cst_5 {dimension_numbers = #tpu.dot_dimension_numbers<[1], [0], [0], [1], [0, 0, 1, 1], [], []>} : vector<32x32xbf16>, vector<32x32xbf16>, vector<32x32xf32> -> vector<32x32xf32>
    %11 = arith.addf %1, %10 : vector<32x32xf32>
    %12 = vector.extract_strided_slice %5 {offsets = [0, 1, 0], sizes = [4, 8, 32], strides = [1, 1, 1]} : vector<4x10x32xbf16> to vector<4x8x32xbf16>
    %13 = vector.shape_cast %12 : vector<4x8x32xbf16> to vector<32x32xbf16>
    %c1 = arith.constant 1 : index
    %c0_6 = arith.constant 0 : index
    %c0_7 = arith.constant 0 : index
    %14 = vector.load %arg3[%c1, %c0_6, %c0_7] : memref<9x32x32xbf16, #tpu.memory_space<vmem>>, vector<1x32x32xbf16>
    %15 = vector.shape_cast %14 : vector<1x32x32xbf16> to vector<32x32xbf16>
    %cst_8 = arith.constant dense<0.000000e+00> : vector<32x32xf32>
    %16 = tpu.matmul %13, %15, %cst_8 {dimension_numbers = #tpu.dot_dimension_numbers<[1], [0], [0], [1], [0, 0, 1, 1], [], []>} : vector<32x32xbf16>, vector<32x32xbf16>, vector<32x32xf32> -> vector<32x32xf32>
    %17 = arith.addf %11, %16 : vector<32x32xf32>
    %18 = vector.extract_strided_slice %5 {offsets = [0, 2, 0], sizes = [4, 8, 32], strides = [1, 1, 1]} : vector<4x10x32xbf16> to vector<4x8x32xbf16>
    %19 = vector.shape_cast %18 : vector<4x8x32xbf16> to vector<32x32xbf16>
    %c2 = arith.constant 2 : index
    %c0_9 = arith.constant 0 : index
    %c0_10 = arith.constant 0 : index
    %20 = vector.load %arg3[%c2, %c0_9, %c0_10] : memref<9x32x32xbf16, #tpu.memory_space<vmem>>, vector<1x32x32xbf16>
    %21 = vector.shape_cast %20 : vector<1x32x32xbf16> to vector<32x32xbf16>
    %cst_11 = arith.constant dense<0.000000e+00> : vector<32x32xf32>
    %22 = tpu.matmul %19, %21, %cst_11 {dimension_numbers = #tpu.dot_dimension_numbers<[1], [0], [0], [1], [0, 0, 1, 1], [], []>} : vector<32x32xbf16>, vector<32x32xbf16>, vector<32x32xf32> -> vector<32x32xf32>
    %23 = arith.addf %17, %22 : vector<32x32xf32>
    %c1_i32 = arith.constant 1 : i32
    %24 = arith.addi %0, %c1_i32 : i32
    %c0_12 = arith.constant 0 : index
    %25 = arith.index_cast %24 : i32 to index
    %c0_13 = arith.constant 0 : index
    %c0_14 = arith.constant 0 : index
    %26 = vector.load %arg2[%c0_12, %25, %c0_13, %c0_14] : memref<1x10x10x32xbf16, #tpu.memory_space<vmem>>, vector<1x4x10x32xbf16>
    %27 = vector.shape_cast %26 : vector<1x4x10x32xbf16> to vector<4x10x32xbf16>
    %28 = vector.extract_strided_slice %27 {offsets = [0, 0, 0], sizes = [4, 8, 32], strides = [1, 1, 1]} : vector<4x10x32xbf16> to vector<4x8x32xbf16>
    %29 = vector.shape_cast %28 : vector<4x8x32xbf16> to vector<32x32xbf16>
    %c3 = arith.constant 3 : index
    %c0_15 = arith.constant 0 : index
    %c0_16 = arith.constant 0 : index
    %30 = vector.load %arg3[%c3, %c0_15, %c0_16] : memref<9x32x32xbf16, #tpu.memory_space<vmem>>, vector<1x32x32xbf16>
    %31 = vector.shape_cast %30 : vector<1x32x32xbf16> to vector<32x32xbf16>
    %cst_17 = arith.constant dense<0.000000e+00> : vector<32x32xf32>
    %32 = tpu.matmul %29, %31, %cst_17 {dimension_numbers = #tpu.dot_dimension_numbers<[1], [0], [0], [1], [0, 0, 1, 1], [], []>} : vector<32x32xbf16>, vector<32x32xbf16>, vector<32x32xf32> -> vector<32x32xf32>
    %33 = arith.addf %23, %32 : vector<32x32xf32>
    %34 = vector.extract_strided_slice %27 {offsets = [0, 1, 0], sizes = [4, 8, 32], strides = [1, 1, 1]} : vector<4x10x32xbf16> to vector<4x8x32xbf16>
    %35 = vector.shape_cast %34 : vector<4x8x32xbf16> to vector<32x32xbf16>
    %c4 = arith.constant 4 : index
    %c0_18 = arith.constant 0 : index
    %c0_19 = arith.constant 0 : index
    %36 = vector.load %arg3[%c4, %c0_18, %c0_19] : memref<9x32x32xbf16, #tpu.memory_space<vmem>>, vector<1x32x32xbf16>
    %37 = vector.shape_cast %36 : vector<1x32x32xbf16> to vector<32x32xbf16>
    %cst_20 = arith.constant dense<0.000000e+00> : vector<32x32xf32>
    %38 = tpu.matmul %35, %37, %cst_20 {dimension_numbers = #tpu.dot_dimension_numbers<[1], [0], [0], [1], [0, 0, 1, 1], [], []>} : vector<32x32xbf16>, vector<32x32xbf16>, vector<32x32xf32> -> vector<32x32xf32>
    %39 = arith.addf %33, %38 : vector<32x32xf32>
    %40 = vector.extract_strided_slice %27 {offsets = [0, 2, 0], sizes = [4, 8, 32], strides = [1, 1, 1]} : vector<4x10x32xbf16> to vector<4x8x32xbf16>
    %41 = vector.shape_cast %40 : vector<4x8x32xbf16> to vector<32x32xbf16>
    %c5 = arith.constant 5 : index
    %c0_21 = arith.constant 0 : index
    %c0_22 = arith.constant 0 : index
    %42 = vector.load %arg3[%c5, %c0_21, %c0_22] : memref<9x32x32xbf16, #tpu.memory_space<vmem>>, vector<1x32x32xbf16>
    %43 = vector.shape_cast %42 : vector<1x32x32xbf16> to vector<32x32xbf16>
    %cst_23 = arith.constant dense<0.000000e+00> : vector<32x32xf32>
    %44 = tpu.matmul %41, %43, %cst_23 {dimension_numbers = #tpu.dot_dimension_numbers<[1], [0], [0], [1], [0, 0, 1, 1], [], []>} : vector<32x32xbf16>, vector<32x32xbf16>, vector<32x32xf32> -> vector<32x32xf32>
    %45 = arith.addf %39, %44 : vector<32x32xf32>
    %c2_i32 = arith.constant 2 : i32
    %46 = arith.addi %0, %c2_i32 : i32
    %c0_24 = arith.constant 0 : index
    %47 = arith.index_cast %46 : i32 to index
    %c0_25 = arith.constant 0 : index
    %c0_26 = arith.constant 0 : index
    %48 = vector.load %arg2[%c0_24, %47, %c0_25, %c0_26] : memref<1x10x10x32xbf16, #tpu.memory_space<vmem>>, vector<1x4x10x32xbf16>
    %49 = vector.shape_cast %48 : vector<1x4x10x32xbf16> to vector<4x10x32xbf16>
    %50 = vector.extract_strided_slice %49 {offsets = [0, 0, 0], sizes = [4, 8, 32], strides = [1, 1, 1]} : vector<4x10x32xbf16> to vector<4x8x32xbf16>
    %51 = vector.shape_cast %50 : vector<4x8x32xbf16> to vector<32x32xbf16>
    %c6 = arith.constant 6 : index
    %c0_27 = arith.constant 0 : index
    %c0_28 = arith.constant 0 : index
    %52 = vector.load %arg3[%c6, %c0_27, %c0_28] : memref<9x32x32xbf16, #tpu.memory_space<vmem>>, vector<1x32x32xbf16>
    %53 = vector.shape_cast %52 : vector<1x32x32xbf16> to vector<32x32xbf16>
    %cst_29 = arith.constant dense<0.000000e+00> : vector<32x32xf32>
    %54 = tpu.matmul %51, %53, %cst_29 {dimension_numbers = #tpu.dot_dimension_numbers<[1], [0], [0], [1], [0, 0, 1, 1], [], []>} : vector<32x32xbf16>, vector<32x32xbf16>, vector<32x32xf32> -> vector<32x32xf32>
    %55 = arith.addf %45, %54 : vector<32x32xf32>
    %56 = vector.extract_strided_slice %49 {offsets = [0, 1, 0], sizes = [4, 8, 32], strides = [1, 1, 1]} : vector<4x10x32xbf16> to vector<4x8x32xbf16>
    %57 = vector.shape_cast %56 : vector<4x8x32xbf16> to vector<32x32xbf16>
    %c7 = arith.constant 7 : index
    %c0_30 = arith.constant 0 : index
    %c0_31 = arith.constant 0 : index
    %58 = vector.load %arg3[%c7, %c0_30, %c0_31] : memref<9x32x32xbf16, #tpu.memory_space<vmem>>, vector<1x32x32xbf16>
    %59 = vector.shape_cast %58 : vector<1x32x32xbf16> to vector<32x32xbf16>
    %cst_32 = arith.constant dense<0.000000e+00> : vector<32x32xf32>
    %60 = tpu.matmul %57, %59, %cst_32 {dimension_numbers = #tpu.dot_dimension_numbers<[1], [0], [0], [1], [0, 0, 1, 1], [], []>} : vector<32x32xbf16>, vector<32x32xbf16>, vector<32x32xf32> -> vector<32x32xf32>
    %61 = arith.addf %55, %60 : vector<32x32xf32>
    %62 = vector.extract_strided_slice %49 {offsets = [0, 2, 0], sizes = [4, 8, 32], strides = [1, 1, 1]} : vector<4x10x32xbf16> to vector<4x8x32xbf16>
    %63 = vector.shape_cast %62 : vector<4x8x32xbf16> to vector<32x32xbf16>
    %c8 = arith.constant 8 : index
    %c0_33 = arith.constant 0 : index
    %c0_34 = arith.constant 0 : index
    %64 = vector.load %arg3[%c8, %c0_33, %c0_34] : memref<9x32x32xbf16, #tpu.memory_space<vmem>>, vector<1x32x32xbf16>
    %65 = vector.shape_cast %64 : vector<1x32x32xbf16> to vector<32x32xbf16>
    %cst_35 = arith.constant dense<0.000000e+00> : vector<32x32xf32>
    %66 = tpu.matmul %63, %65, %cst_35 {dimension_numbers = #tpu.dot_dimension_numbers<[1], [0], [0], [1], [0, 0, 1, 1], [], []>} : vector<32x32xbf16>, vector<32x32xbf16>, vector<32x32xf32> -> vector<32x32xf32>
    %67 = arith.addf %61, %66 : vector<32x32xf32>
    %c0_36 = arith.constant 0 : index
    %c0_37 = arith.constant 0 : index
    %68 = vector.load %arg4[%c0_36, %c0_37] : memref<1x32xf32, #tpu.memory_space<vmem>>, vector<1x32xf32>
    %69 = vector.broadcast %68 : vector<1x32xf32> to vector<32x32xf32>
    %70 = arith.addf %67, %69 : vector<32x32xf32>
    %cst_38 = arith.constant 0.000000e+00 : f32
    %71 = vector.broadcast %cst_38 : f32 to vector<32x32xf32>
    %72 = arith.maximumf %70, %71 : vector<32x32xf32>
    %73 = vector.shape_cast %72 : vector<32x32xf32> to vector<4x8x32xf32>
    %74 = arith.truncf %73 : vector<4x8x32xf32> to vector<4x8x32xbf16>
    %c0_39 = arith.constant 0 : index
    %c0_40 = arith.constant 0 : index
    %c0_41 = arith.constant 0 : index
    %c0_42 = arith.constant 0 : index
    %75 = vector.load %arg5[%c0_39, %c0_40, %c0_41, %c0_42] : memref<1x4x8x32xbf16, #tpu.memory_space<vmem>>, vector<1x4x8x32xbf16>
    %76 = vector.shape_cast %75 : vector<1x4x8x32xbf16> to vector<4x8x32xbf16>
    %77 = vector.shape_cast %74 : vector<4x8x32xbf16> to vector<1x4x8x32xbf16>
    tpu.vector_store %arg5[%c0_39, %c0_40, %c0_41, %c0_42], %77 {strides = array<i32>} : memref<1x4x8x32xbf16, #tpu.memory_space<vmem>>, vector<1x4x8x32xbf16>,
    return
  }
  func.func @transform_0(%arg0: i32, %arg1: i32) -> (i32, i32, i32, i32) {
    %c0_i32 = arith.constant 0 : i32
    %c0_i32_0 = arith.constant 0 : i32
    %c0_i32_1 = arith.constant 0 : i32
    %c0_i32_2 = arith.constant 0 : i32
    return %arg0, %c0_i32, %c0_i32_0, %c0_i32_1 : i32, i32, i32, i32
  }
  func.func @transform_1(%arg0: i32, %arg1: i32) -> (i32, i32, i32) {
    %c0_i32 = arith.constant 0 : i32
    %c0_i32_0 = arith.constant 0 : i32
    %c0_i32_1 = arith.constant 0 : i32
    %c0_i32_2 = arith.constant 0 : i32
    return %c0_i32, %c0_i32_0, %c0_i32_1 : i32, i32, i32
  }
  func.func @transform_2(%arg0: i32, %arg1: i32) -> (i32, i32) {
    %c0_i32 = arith.constant 0 : i32
    %c0_i32_0 = arith.constant 0 : i32
    %c0_i32_1 = arith.constant 0 : i32
    return %c0_i32, %c0_i32_0 : i32, i32
  }
  func.func @transform_3(%arg0: i32, %arg1: i32) -> (i32, i32, i32, i32) {
    %c0_i32 = arith.constant 0 : i32
    %c0_i32_0 = arith.constant 0 : i32
    %c0_i32_1 = arith.constant 0 : i32
    return %arg0, %arg1, %c0_i32, %c0_i32_0 : i32, i32, i32, i32
  }
}

module attributes {stable_mosaic.version = 11 : i64} {
  func.func @_conv3x3_res_kernel(%arg0: i32, %arg1: i32, %arg2: memref<1x10x10x32xbf16, #tpu.memory_space<vmem>>, %arg3: memref<9x32x32xbf16, #tpu.memory_space<vmem>>, %arg4: memref<1x32xf32, #tpu.memory_space<vmem>>, %arg5: memref<1x4x8x32xbf16, #tpu.memory_space<vmem>>, %arg6: memref<1x4x8x32xbf16, #tpu.memory_space<vmem>>) attributes {dimension_semantics = [#tpu.dimension_semantics<parallel>, #tpu.dimension_semantics<parallel>], iteration_bounds = array<i64: 2, 2>, scalar_prefetch = 0 : i64, scratch_operands = 0 : i64, tpu.core_type = #tpu.core_type<tc>, window_params = [{transform_indices = @transform_0, window_bounds = array<i64: 1, 10, 10, 32>}, {pipeline_mode = #tpu.pipeline_mode<synchronous>, transform_indices = @transform_1, window_bounds = array<i64: 9, 32, 32>}, {pipeline_mode = #tpu.pipeline_mode<synchronous>, transform_indices = @transform_2, window_bounds = array<i64: 1, 32>}, {transform_indices = @transform_3, window_bounds = array<i64: 1, 4, 8, 32>}, {transform_indices = @transform_4, window_bounds = array<i64: 1, 4, 8, 32>}]} {
    %c4_i32 = arith.constant 4 : i32
    %0 = arith.muli %arg1, %c4_i32 : i32
    %cst = arith.constant 0.000000e+00 : f32
    %1 = vector.broadcast %cst : f32 to vector<32x32xf32>
    %c0_i32 = arith.constant 0 : i32
    %2 = arith.addi %0, %c0_i32 : i32
    %c0 = arith.constant 0 : index
    %3 = arith.index_cast %2 : i32 to index
    %c0_0 = arith.constant 0 : index
    %c0_1 = arith.constant 0 : index
    %4 = vector.load %arg2[%c0, %3, %c0_0, %c0_1] : memref<1x10x10x32xbf16, #tpu.memory_space<vmem>>, vector<1x4x10x32xbf16>
    %5 = vector.shape_cast %4 : vector<1x4x10x32xbf16> to vector<4x10x32xbf16>
    %6 = vector.extract_strided_slice %5 {offsets = [0, 0, 0], sizes = [4, 8, 32], strides = [1, 1, 1]} : vector<4x10x32xbf16> to vector<4x8x32xbf16>
    %7 = vector.shape_cast %6 : vector<4x8x32xbf16> to vector<32x32xbf16>
    %c0_2 = arith.constant 0 : index
    %c0_3 = arith.constant 0 : index
    %c0_4 = arith.constant 0 : index
    %8 = vector.load %arg3[%c0_2, %c0_3, %c0_4] : memref<9x32x32xbf16, #tpu.memory_space<vmem>>, vector<1x32x32xbf16>
    %9 = vector.shape_cast %8 : vector<1x32x32xbf16> to vector<32x32xbf16>
    %cst_5 = arith.constant dense<0.000000e+00> : vector<32x32xf32>
    %10 = tpu.matmul %7, %9, %cst_5 {dimension_numbers = #tpu.dot_dimension_numbers<[1], [0], [0], [1], [0, 0, 1, 1], [], []>} : vector<32x32xbf16>, vector<32x32xbf16>, vector<32x32xf32> -> vector<32x32xf32>
    %11 = arith.addf %1, %10 : vector<32x32xf32>
    %12 = vector.extract_strided_slice %5 {offsets = [0, 1, 0], sizes = [4, 8, 32], strides = [1, 1, 1]} : vector<4x10x32xbf16> to vector<4x8x32xbf16>
    %13 = vector.shape_cast %12 : vector<4x8x32xbf16> to vector<32x32xbf16>
    %c1 = arith.constant 1 : index
    %c0_6 = arith.constant 0 : index
    %c0_7 = arith.constant 0 : index
    %14 = vector.load %arg3[%c1, %c0_6, %c0_7] : memref<9x32x32xbf16, #tpu.memory_space<vmem>>, vector<1x32x32xbf16>
    %15 = vector.shape_cast %14 : vector<1x32x32xbf16> to vector<32x32xbf16>
    %cst_8 = arith.constant dense<0.000000e+00> : vector<32x32xf32>
    %16 = tpu.matmul %13, %15, %cst_8 {dimension_numbers = #tpu.dot_dimension_numbers<[1], [0], [0], [1], [0, 0, 1, 1], [], []>} : vector<32x32xbf16>, vector<32x32xbf16>, vector<32x32xf32> -> vector<32x32xf32>
    %17 = arith.addf %11, %16 : vector<32x32xf32>
    %18 = vector.extract_strided_slice %5 {offsets = [0, 2, 0], sizes = [4, 8, 32], strides = [1, 1, 1]} : vector<4x10x32xbf16> to vector<4x8x32xbf16>
    %19 = vector.shape_cast %18 : vector<4x8x32xbf16> to vector<32x32xbf16>
    %c2 = arith.constant 2 : index
    %c0_9 = arith.constant 0 : index
    %c0_10 = arith.constant 0 : index
    %20 = vector.load %arg3[%c2, %c0_9, %c0_10] : memref<9x32x32xbf16, #tpu.memory_space<vmem>>, vector<1x32x32xbf16>
    %21 = vector.shape_cast %20 : vector<1x32x32xbf16> to vector<32x32xbf16>
    %cst_11 = arith.constant dense<0.000000e+00> : vector<32x32xf32>
    %22 = tpu.matmul %19, %21, %cst_11 {dimension_numbers = #tpu.dot_dimension_numbers<[1], [0], [0], [1], [0, 0, 1, 1], [], []>} : vector<32x32xbf16>, vector<32x32xbf16>, vector<32x32xf32> -> vector<32x32xf32>
    %23 = arith.addf %17, %22 : vector<32x32xf32>
    %c1_i32 = arith.constant 1 : i32
    %24 = arith.addi %0, %c1_i32 : i32
    %c0_12 = arith.constant 0 : index
    %25 = arith.index_cast %24 : i32 to index
    %c0_13 = arith.constant 0 : index
    %c0_14 = arith.constant 0 : index
    %26 = vector.load %arg2[%c0_12, %25, %c0_13, %c0_14] : memref<1x10x10x32xbf16, #tpu.memory_space<vmem>>, vector<1x4x10x32xbf16>
    %27 = vector.shape_cast %26 : vector<1x4x10x32xbf16> to vector<4x10x32xbf16>
    %28 = vector.extract_strided_slice %27 {offsets = [0, 0, 0], sizes = [4, 8, 32], strides = [1, 1, 1]} : vector<4x10x32xbf16> to vector<4x8x32xbf16>
    %29 = vector.shape_cast %28 : vector<4x8x32xbf16> to vector<32x32xbf16>
    %c3 = arith.constant 3 : index
    %c0_15 = arith.constant 0 : index
    %c0_16 = arith.constant 0 : index
    %30 = vector.load %arg3[%c3, %c0_15, %c0_16] : memref<9x32x32xbf16, #tpu.memory_space<vmem>>, vector<1x32x32xbf16>
    %31 = vector.shape_cast %30 : vector<1x32x32xbf16> to vector<32x32xbf16>
    %cst_17 = arith.constant dense<0.000000e+00> : vector<32x32xf32>
    %32 = tpu.matmul %29, %31, %cst_17 {dimension_numbers = #tpu.dot_dimension_numbers<[1], [0], [0], [1], [0, 0, 1, 1], [], []>} : vector<32x32xbf16>, vector<32x32xbf16>, vector<32x32xf32> -> vector<32x32xf32>
    %33 = arith.addf %23, %32 : vector<32x32xf32>
    %34 = vector.extract_strided_slice %27 {offsets = [0, 1, 0], sizes = [4, 8, 32], strides = [1, 1, 1]} : vector<4x10x32xbf16> to vector<4x8x32xbf16>
    %35 = vector.shape_cast %34 : vector<4x8x32xbf16> to vector<32x32xbf16>
    %c4 = arith.constant 4 : index
    %c0_18 = arith.constant 0 : index
    %c0_19 = arith.constant 0 : index
    %36 = vector.load %arg3[%c4, %c0_18, %c0_19] : memref<9x32x32xbf16, #tpu.memory_space<vmem>>, vector<1x32x32xbf16>
    %37 = vector.shape_cast %36 : vector<1x32x32xbf16> to vector<32x32xbf16>
    %cst_20 = arith.constant dense<0.000000e+00> : vector<32x32xf32>
    %38 = tpu.matmul %35, %37, %cst_20 {dimension_numbers = #tpu.dot_dimension_numbers<[1], [0], [0], [1], [0, 0, 1, 1], [], []>} : vector<32x32xbf16>, vector<32x32xbf16>, vector<32x32xf32> -> vector<32x32xf32>
    %39 = arith.addf %33, %38 : vector<32x32xf32>
    %40 = vector.extract_strided_slice %27 {offsets = [0, 2, 0], sizes = [4, 8, 32], strides = [1, 1, 1]} : vector<4x10x32xbf16> to vector<4x8x32xbf16>
    %41 = vector.shape_cast %40 : vector<4x8x32xbf16> to vector<32x32xbf16>
    %c5 = arith.constant 5 : index
    %c0_21 = arith.constant 0 : index
    %c0_22 = arith.constant 0 : index
    %42 = vector.load %arg3[%c5, %c0_21, %c0_22] : memref<9x32x32xbf16, #tpu.memory_space<vmem>>, vector<1x32x32xbf16>
    %43 = vector.shape_cast %42 : vector<1x32x32xbf16> to vector<32x32xbf16>
    %cst_23 = arith.constant dense<0.000000e+00> : vector<32x32xf32>
    %44 = tpu.matmul %41, %43, %cst_23 {dimension_numbers = #tpu.dot_dimension_numbers<[1], [0], [0], [1], [0, 0, 1, 1], [], []>} : vector<32x32xbf16>, vector<32x32xbf16>, vector<32x32xf32> -> vector<32x32xf32>
    %45 = arith.addf %39, %44 : vector<32x32xf32>
    %c2_i32 = arith.constant 2 : i32
    %46 = arith.addi %0, %c2_i32 : i32
    %c0_24 = arith.constant 0 : index
    %47 = arith.index_cast %46 : i32 to index
    %c0_25 = arith.constant 0 : index
    %c0_26 = arith.constant 0 : index
    %48 = vector.load %arg2[%c0_24, %47, %c0_25, %c0_26] : memref<1x10x10x32xbf16, #tpu.memory_space<vmem>>, vector<1x4x10x32xbf16>
    %49 = vector.shape_cast %48 : vector<1x4x10x32xbf16> to vector<4x10x32xbf16>
    %50 = vector.extract_strided_slice %49 {offsets = [0, 0, 0], sizes = [4, 8, 32], strides = [1, 1, 1]} : vector<4x10x32xbf16> to vector<4x8x32xbf16>
    %51 = vector.shape_cast %50 : vector<4x8x32xbf16> to vector<32x32xbf16>
    %c6 = arith.constant 6 : index
    %c0_27 = arith.constant 0 : index
    %c0_28 = arith.constant 0 : index
    %52 = vector.load %arg3[%c6, %c0_27, %c0_28] : memref<9x32x32xbf16, #tpu.memory_space<vmem>>, vector<1x32x32xbf16>
    %53 = vector.shape_cast %52 : vector<1x32x32xbf16> to vector<32x32xbf16>
    %cst_29 = arith.constant dense<0.000000e+00> : vector<32x32xf32>
    %54 = tpu.matmul %51, %53, %cst_29 {dimension_numbers = #tpu.dot_dimension_numbers<[1], [0], [0], [1], [0, 0, 1, 1], [], []>} : vector<32x32xbf16>, vector<32x32xbf16>, vector<32x32xf32> -> vector<32x32xf32>
    %55 = arith.addf %45, %54 : vector<32x32xf32>
    %56 = vector.extract_strided_slice %49 {offsets = [0, 1, 0], sizes = [4, 8, 32], strides = [1, 1, 1]} : vector<4x10x32xbf16> to vector<4x8x32xbf16>
    %57 = vector.shape_cast %56 : vector<4x8x32xbf16> to vector<32x32xbf16>
    %c7 = arith.constant 7 : index
    %c0_30 = arith.constant 0 : index
    %c0_31 = arith.constant 0 : index
    %58 = vector.load %arg3[%c7, %c0_30, %c0_31] : memref<9x32x32xbf16, #tpu.memory_space<vmem>>, vector<1x32x32xbf16>
    %59 = vector.shape_cast %58 : vector<1x32x32xbf16> to vector<32x32xbf16>
    %cst_32 = arith.constant dense<0.000000e+00> : vector<32x32xf32>
    %60 = tpu.matmul %57, %59, %cst_32 {dimension_numbers = #tpu.dot_dimension_numbers<[1], [0], [0], [1], [0, 0, 1, 1], [], []>} : vector<32x32xbf16>, vector<32x32xbf16>, vector<32x32xf32> -> vector<32x32xf32>
    %61 = arith.addf %55, %60 : vector<32x32xf32>
    %62 = vector.extract_strided_slice %49 {offsets = [0, 2, 0], sizes = [4, 8, 32], strides = [1, 1, 1]} : vector<4x10x32xbf16> to vector<4x8x32xbf16>
    %63 = vector.shape_cast %62 : vector<4x8x32xbf16> to vector<32x32xbf16>
    %c8 = arith.constant 8 : index
    %c0_33 = arith.constant 0 : index
    %c0_34 = arith.constant 0 : index
    %64 = vector.load %arg3[%c8, %c0_33, %c0_34] : memref<9x32x32xbf16, #tpu.memory_space<vmem>>, vector<1x32x32xbf16>
    %65 = vector.shape_cast %64 : vector<1x32x32xbf16> to vector<32x32xbf16>
    %cst_35 = arith.constant dense<0.000000e+00> : vector<32x32xf32>
    %66 = tpu.matmul %63, %65, %cst_35 {dimension_numbers = #tpu.dot_dimension_numbers<[1], [0], [0], [1], [0, 0, 1, 1], [], []>} : vector<32x32xbf16>, vector<32x32xbf16>, vector<32x32xf32> -> vector<32x32xf32>
    %67 = arith.addf %61, %66 : vector<32x32xf32>
    %c0_36 = arith.constant 0 : index
    %c0_37 = arith.constant 0 : index
    %68 = vector.load %arg4[%c0_36, %c0_37] : memref<1x32xf32, #tpu.memory_space<vmem>>, vector<1x32xf32>
    %69 = vector.broadcast %68 : vector<1x32xf32> to vector<32x32xf32>
    %70 = arith.addf %67, %69 : vector<32x32xf32>
    %c0_38 = arith.constant 0 : index
    %c0_39 = arith.constant 0 : index
    %c0_40 = arith.constant 0 : index
    %c0_41 = arith.constant 0 : index
    %71 = vector.load %arg5[%c0_38, %c0_39, %c0_40, %c0_41] : memref<1x4x8x32xbf16, #tpu.memory_space<vmem>>, vector<1x4x8x32xbf16>
    %72 = vector.shape_cast %71 : vector<1x4x8x32xbf16> to vector<4x8x32xbf16>
    %73 = vector.shape_cast %72 : vector<4x8x32xbf16> to vector<32x32xbf16>
    %74 = arith.extf %73 : vector<32x32xbf16> to vector<32x32xf32>
    %75 = arith.addf %70, %74 : vector<32x32xf32>
    %cst_42 = arith.constant 0.000000e+00 : f32
    %76 = vector.broadcast %cst_42 : f32 to vector<32x32xf32>
    %77 = arith.maximumf %75, %76 : vector<32x32xf32>
    %78 = vector.shape_cast %77 : vector<32x32xf32> to vector<4x8x32xf32>
    %79 = arith.truncf %78 : vector<4x8x32xf32> to vector<4x8x32xbf16>
    %c0_43 = arith.constant 0 : index
    %c0_44 = arith.constant 0 : index
    %c0_45 = arith.constant 0 : index
    %c0_46 = arith.constant 0 : index
    %80 = vector.load %arg6[%c0_43, %c0_44, %c0_45, %c0_46] : memref<1x4x8x32xbf16, #tpu.memory_space<vmem>>, vector<1x4x8x32xbf16>
    %81 = vector.shape_cast %80 : vector<1x4x8x32xbf16> to vector<4x8x32xbf16>
    %82 = vector.shape_cast %79 : vector<4x8x32xbf16> to vector<1x4x8x32xbf16>
    tpu.vector_store %arg6[%c0_43, %c0_44, %c0_45, %c0_46], %82 {strides = array<i32>} : memref<1x4x8x32xbf16, #tpu.memory_space<vmem>>, vector<1x4x8x32xbf16>,
    return
  }
  func.func @transform_0(%arg0: i32, %arg1: i32) -> (i32, i32, i32, i32) {
    %c0_i32 = arith.constant 0 : i32
    %c0_i32_0 = arith.constant 0 : i32
    %c0_i32_1 = arith.constant 0 : i32
    %c0_i32_2 = arith.constant 0 : i32
    return %arg0, %c0_i32, %c0_i32_0, %c0_i32_1 : i32, i32, i32, i32
  }
  func.func @transform_1(%arg0: i32, %arg1: i32) -> (i32, i32, i32) {
    %c0_i32 = arith.constant 0 : i32
    %c0_i32_0 = arith.constant 0 : i32
    %c0_i32_1 = arith.constant 0 : i32
    %c0_i32_2 = arith.constant 0 : i32
    return %c0_i32, %c0_i32_0, %c0_i32_1 : i32, i32, i32
  }
  func.func @transform_2(%arg0: i32, %arg1: i32) -> (i32, i32) {
    %c0_i32 = arith.constant 0 : i32
    %c0_i32_0 = arith.constant 0 : i32
    %c0_i32_1 = arith.constant 0 : i32
    return %c0_i32, %c0_i32_0 : i32, i32
  }
  func.func @transform_3(%arg0: i32, %arg1: i32) -> (i32, i32, i32, i32) {
    %c0_i32 = arith.constant 0 : i32
    %c0_i32_0 = arith.constant 0 : i32
    %c0_i32_1 = arith.constant 0 : i32
    return %arg0, %arg1, %c0_i32, %c0_i32_0 : i32, i32, i32, i32
  }
  func.func @transform_4(%arg0: i32, %arg1: i32) -> (i32, i32, i32, i32) {
    %c0_i32 = arith.constant 0 : i32
    %c0_i32_0 = arith.constant 0 : i32
    %c0_i32_1 = arith.constant 0 : i32
    return %arg0, %arg1, %c0_i32, %c0_i32_0 : i32, i32, i32, i32
  }
}

module attributes {stable_mosaic.version = 11 : i64} {
  func.func @_conv3x3_res_kernel(%arg0: i32, %arg1: i32, %arg2: memref<1x10x10x32xbf16, #tpu.memory_space<vmem>>, %arg3: memref<9x32x32xbf16, #tpu.memory_space<vmem>>, %arg4: memref<1x32xf32, #tpu.memory_space<vmem>>, %arg5: memref<1x4x8x32xbf16, #tpu.memory_space<vmem>>, %arg6: memref<1x4x8x32xf32, #tpu.memory_space<vmem>>) attributes {dimension_semantics = [#tpu.dimension_semantics<parallel>, #tpu.dimension_semantics<parallel>], iteration_bounds = array<i64: 2, 2>, scalar_prefetch = 0 : i64, scratch_operands = 0 : i64, tpu.core_type = #tpu.core_type<tc>, window_params = [{transform_indices = @transform_0, window_bounds = array<i64: 1, 10, 10, 32>}, {pipeline_mode = #tpu.pipeline_mode<synchronous>, transform_indices = @transform_1, window_bounds = array<i64: 9, 32, 32>}, {pipeline_mode = #tpu.pipeline_mode<synchronous>, transform_indices = @transform_2, window_bounds = array<i64: 1, 32>}, {transform_indices = @transform_3, window_bounds = array<i64: 1, 4, 8, 32>}, {transform_indices = @transform_4, window_bounds = array<i64: 1, 4, 8, 32>}]} {
    %c4_i32 = arith.constant 4 : i32
    %0 = arith.muli %arg1, %c4_i32 : i32
    %cst = arith.constant 0.000000e+00 : f32
    %1 = vector.broadcast %cst : f32 to vector<32x32xf32>
    %c0_i32 = arith.constant 0 : i32
    %2 = arith.addi %0, %c0_i32 : i32
    %c0 = arith.constant 0 : index
    %3 = arith.index_cast %2 : i32 to index
    %c0_0 = arith.constant 0 : index
    %c0_1 = arith.constant 0 : index
    %4 = vector.load %arg2[%c0, %3, %c0_0, %c0_1] : memref<1x10x10x32xbf16, #tpu.memory_space<vmem>>, vector<1x4x10x32xbf16>
    %5 = vector.shape_cast %4 : vector<1x4x10x32xbf16> to vector<4x10x32xbf16>
    %6 = vector.extract_strided_slice %5 {offsets = [0, 0, 0], sizes = [4, 8, 32], strides = [1, 1, 1]} : vector<4x10x32xbf16> to vector<4x8x32xbf16>
    %7 = vector.shape_cast %6 : vector<4x8x32xbf16> to vector<32x32xbf16>
    %c0_2 = arith.constant 0 : index
    %c0_3 = arith.constant 0 : index
    %c0_4 = arith.constant 0 : index
    %8 = vector.load %arg3[%c0_2, %c0_3, %c0_4] : memref<9x32x32xbf16, #tpu.memory_space<vmem>>, vector<1x32x32xbf16>
    %9 = vector.shape_cast %8 : vector<1x32x32xbf16> to vector<32x32xbf16>
    %cst_5 = arith.constant dense<0.000000e+00> : vector<32x32xf32>
    %10 = tpu.matmul %7, %9, %cst_5 {dimension_numbers = #tpu.dot_dimension_numbers<[1], [0], [0], [1], [0, 0, 1, 1], [], []>} : vector<32x32xbf16>, vector<32x32xbf16>, vector<32x32xf32> -> vector<32x32xf32>
    %11 = arith.addf %1, %10 : vector<32x32xf32>
    %12 = vector.extract_strided_slice %5 {offsets = [0, 1, 0], sizes = [4, 8, 32], strides = [1, 1, 1]} : vector<4x10x32xbf16> to vector<4x8x32xbf16>
    %13 = vector.shape_cast %12 : vector<4x8x32xbf16> to vector<32x32xbf16>
    %c1 = arith.constant 1 : index
    %c0_6 = arith.constant 0 : index
    %c0_7 = arith.constant 0 : index
    %14 = vector.load %arg3[%c1, %c0_6, %c0_7] : memref<9x32x32xbf16, #tpu.memory_space<vmem>>, vector<1x32x32xbf16>
    %15 = vector.shape_cast %14 : vector<1x32x32xbf16> to vector<32x32xbf16>
    %cst_8 = arith.constant dense<0.000000e+00> : vector<32x32xf32>
    %16 = tpu.matmul %13, %15, %cst_8 {dimension_numbers = #tpu.dot_dimension_numbers<[1], [0], [0], [1], [0, 0, 1, 1], [], []>} : vector<32x32xbf16>, vector<32x32xbf16>, vector<32x32xf32> -> vector<32x32xf32>
    %17 = arith.addf %11, %16 : vector<32x32xf32>
    %18 = vector.extract_strided_slice %5 {offsets = [0, 2, 0], sizes = [4, 8, 32], strides = [1, 1, 1]} : vector<4x10x32xbf16> to vector<4x8x32xbf16>
    %19 = vector.shape_cast %18 : vector<4x8x32xbf16> to vector<32x32xbf16>
    %c2 = arith.constant 2 : index
    %c0_9 = arith.constant 0 : index
    %c0_10 = arith.constant 0 : index
    %20 = vector.load %arg3[%c2, %c0_9, %c0_10] : memref<9x32x32xbf16, #tpu.memory_space<vmem>>, vector<1x32x32xbf16>
    %21 = vector.shape_cast %20 : vector<1x32x32xbf16> to vector<32x32xbf16>
    %cst_11 = arith.constant dense<0.000000e+00> : vector<32x32xf32>
    %22 = tpu.matmul %19, %21, %cst_11 {dimension_numbers = #tpu.dot_dimension_numbers<[1], [0], [0], [1], [0, 0, 1, 1], [], []>} : vector<32x32xbf16>, vector<32x32xbf16>, vector<32x32xf32> -> vector<32x32xf32>
    %23 = arith.addf %17, %22 : vector<32x32xf32>
    %c1_i32 = arith.constant 1 : i32
    %24 = arith.addi %0, %c1_i32 : i32
    %c0_12 = arith.constant 0 : index
    %25 = arith.index_cast %24 : i32 to index
    %c0_13 = arith.constant 0 : index
    %c0_14 = arith.constant 0 : index
    %26 = vector.load %arg2[%c0_12, %25, %c0_13, %c0_14] : memref<1x10x10x32xbf16, #tpu.memory_space<vmem>>, vector<1x4x10x32xbf16>
    %27 = vector.shape_cast %26 : vector<1x4x10x32xbf16> to vector<4x10x32xbf16>
    %28 = vector.extract_strided_slice %27 {offsets = [0, 0, 0], sizes = [4, 8, 32], strides = [1, 1, 1]} : vector<4x10x32xbf16> to vector<4x8x32xbf16>
    %29 = vector.shape_cast %28 : vector<4x8x32xbf16> to vector<32x32xbf16>
    %c3 = arith.constant 3 : index
    %c0_15 = arith.constant 0 : index
    %c0_16 = arith.constant 0 : index
    %30 = vector.load %arg3[%c3, %c0_15, %c0_16] : memref<9x32x32xbf16, #tpu.memory_space<vmem>>, vector<1x32x32xbf16>
    %31 = vector.shape_cast %30 : vector<1x32x32xbf16> to vector<32x32xbf16>
    %cst_17 = arith.constant dense<0.000000e+00> : vector<32x32xf32>
    %32 = tpu.matmul %29, %31, %cst_17 {dimension_numbers = #tpu.dot_dimension_numbers<[1], [0], [0], [1], [0, 0, 1, 1], [], []>} : vector<32x32xbf16>, vector<32x32xbf16>, vector<32x32xf32> -> vector<32x32xf32>
    %33 = arith.addf %23, %32 : vector<32x32xf32>
    %34 = vector.extract_strided_slice %27 {offsets = [0, 1, 0], sizes = [4, 8, 32], strides = [1, 1, 1]} : vector<4x10x32xbf16> to vector<4x8x32xbf16>
    %35 = vector.shape_cast %34 : vector<4x8x32xbf16> to vector<32x32xbf16>
    %c4 = arith.constant 4 : index
    %c0_18 = arith.constant 0 : index
    %c0_19 = arith.constant 0 : index
    %36 = vector.load %arg3[%c4, %c0_18, %c0_19] : memref<9x32x32xbf16, #tpu.memory_space<vmem>>, vector<1x32x32xbf16>
    %37 = vector.shape_cast %36 : vector<1x32x32xbf16> to vector<32x32xbf16>
    %cst_20 = arith.constant dense<0.000000e+00> : vector<32x32xf32>
    %38 = tpu.matmul %35, %37, %cst_20 {dimension_numbers = #tpu.dot_dimension_numbers<[1], [0], [0], [1], [0, 0, 1, 1], [], []>} : vector<32x32xbf16>, vector<32x32xbf16>, vector<32x32xf32> -> vector<32x32xf32>
    %39 = arith.addf %33, %38 : vector<32x32xf32>
    %40 = vector.extract_strided_slice %27 {offsets = [0, 2, 0], sizes = [4, 8, 32], strides = [1, 1, 1]} : vector<4x10x32xbf16> to vector<4x8x32xbf16>
    %41 = vector.shape_cast %40 : vector<4x8x32xbf16> to vector<32x32xbf16>
    %c5 = arith.constant 5 : index
    %c0_21 = arith.constant 0 : index
    %c0_22 = arith.constant 0 : index
    %42 = vector.load %arg3[%c5, %c0_21, %c0_22] : memref<9x32x32xbf16, #tpu.memory_space<vmem>>, vector<1x32x32xbf16>
    %43 = vector.shape_cast %42 : vector<1x32x32xbf16> to vector<32x32xbf16>
    %cst_23 = arith.constant dense<0.000000e+00> : vector<32x32xf32>
    %44 = tpu.matmul %41, %43, %cst_23 {dimension_numbers = #tpu.dot_dimension_numbers<[1], [0], [0], [1], [0, 0, 1, 1], [], []>} : vector<32x32xbf16>, vector<32x32xbf16>, vector<32x32xf32> -> vector<32x32xf32>
    %45 = arith.addf %39, %44 : vector<32x32xf32>
    %c2_i32 = arith.constant 2 : i32
    %46 = arith.addi %0, %c2_i32 : i32
    %c0_24 = arith.constant 0 : index
    %47 = arith.index_cast %46 : i32 to index
    %c0_25 = arith.constant 0 : index
    %c0_26 = arith.constant 0 : index
    %48 = vector.load %arg2[%c0_24, %47, %c0_25, %c0_26] : memref<1x10x10x32xbf16, #tpu.memory_space<vmem>>, vector<1x4x10x32xbf16>
    %49 = vector.shape_cast %48 : vector<1x4x10x32xbf16> to vector<4x10x32xbf16>
    %50 = vector.extract_strided_slice %49 {offsets = [0, 0, 0], sizes = [4, 8, 32], strides = [1, 1, 1]} : vector<4x10x32xbf16> to vector<4x8x32xbf16>
    %51 = vector.shape_cast %50 : vector<4x8x32xbf16> to vector<32x32xbf16>
    %c6 = arith.constant 6 : index
    %c0_27 = arith.constant 0 : index
    %c0_28 = arith.constant 0 : index
    %52 = vector.load %arg3[%c6, %c0_27, %c0_28] : memref<9x32x32xbf16, #tpu.memory_space<vmem>>, vector<1x32x32xbf16>
    %53 = vector.shape_cast %52 : vector<1x32x32xbf16> to vector<32x32xbf16>
    %cst_29 = arith.constant dense<0.000000e+00> : vector<32x32xf32>
    %54 = tpu.matmul %51, %53, %cst_29 {dimension_numbers = #tpu.dot_dimension_numbers<[1], [0], [0], [1], [0, 0, 1, 1], [], []>} : vector<32x32xbf16>, vector<32x32xbf16>, vector<32x32xf32> -> vector<32x32xf32>
    %55 = arith.addf %45, %54 : vector<32x32xf32>
    %56 = vector.extract_strided_slice %49 {offsets = [0, 1, 0], sizes = [4, 8, 32], strides = [1, 1, 1]} : vector<4x10x32xbf16> to vector<4x8x32xbf16>
    %57 = vector.shape_cast %56 : vector<4x8x32xbf16> to vector<32x32xbf16>
    %c7 = arith.constant 7 : index
    %c0_30 = arith.constant 0 : index
    %c0_31 = arith.constant 0 : index
    %58 = vector.load %arg3[%c7, %c0_30, %c0_31] : memref<9x32x32xbf16, #tpu.memory_space<vmem>>, vector<1x32x32xbf16>
    %59 = vector.shape_cast %58 : vector<1x32x32xbf16> to vector<32x32xbf16>
    %cst_32 = arith.constant dense<0.000000e+00> : vector<32x32xf32>
    %60 = tpu.matmul %57, %59, %cst_32 {dimension_numbers = #tpu.dot_dimension_numbers<[1], [0], [0], [1], [0, 0, 1, 1], [], []>} : vector<32x32xbf16>, vector<32x32xbf16>, vector<32x32xf32> -> vector<32x32xf32>
    %61 = arith.addf %55, %60 : vector<32x32xf32>
    %62 = vector.extract_strided_slice %49 {offsets = [0, 2, 0], sizes = [4, 8, 32], strides = [1, 1, 1]} : vector<4x10x32xbf16> to vector<4x8x32xbf16>
    %63 = vector.shape_cast %62 : vector<4x8x32xbf16> to vector<32x32xbf16>
    %c8 = arith.constant 8 : index
    %c0_33 = arith.constant 0 : index
    %c0_34 = arith.constant 0 : index
    %64 = vector.load %arg3[%c8, %c0_33, %c0_34] : memref<9x32x32xbf16, #tpu.memory_space<vmem>>, vector<1x32x32xbf16>
    %65 = vector.shape_cast %64 : vector<1x32x32xbf16> to vector<32x32xbf16>
    %cst_35 = arith.constant dense<0.000000e+00> : vector<32x32xf32>
    %66 = tpu.matmul %63, %65, %cst_35 {dimension_numbers = #tpu.dot_dimension_numbers<[1], [0], [0], [1], [0, 0, 1, 1], [], []>} : vector<32x32xbf16>, vector<32x32xbf16>, vector<32x32xf32> -> vector<32x32xf32>
    %67 = arith.addf %61, %66 : vector<32x32xf32>
    %c0_36 = arith.constant 0 : index
    %c0_37 = arith.constant 0 : index
    %68 = vector.load %arg4[%c0_36, %c0_37] : memref<1x32xf32, #tpu.memory_space<vmem>>, vector<1x32xf32>
    %69 = vector.broadcast %68 : vector<1x32xf32> to vector<32x32xf32>
    %70 = arith.addf %67, %69 : vector<32x32xf32>
    %cst_38 = arith.constant 0.000000e+00 : f32
    %71 = vector.broadcast %cst_38 : f32 to vector<32x32xf32>
    %72 = arith.maximumf %70, %71 : vector<32x32xf32>
    %c0_39 = arith.constant 0 : index
    %c0_40 = arith.constant 0 : index
    %c0_41 = arith.constant 0 : index
    %c0_42 = arith.constant 0 : index
    %73 = vector.load %arg5[%c0_39, %c0_40, %c0_41, %c0_42] : memref<1x4x8x32xbf16, #tpu.memory_space<vmem>>, vector<1x4x8x32xbf16>
    %74 = vector.shape_cast %73 : vector<1x4x8x32xbf16> to vector<4x8x32xbf16>
    %75 = vector.shape_cast %74 : vector<4x8x32xbf16> to vector<32x32xbf16>
    %76 = arith.extf %75 : vector<32x32xbf16> to vector<32x32xf32>
    %77 = arith.addf %72, %76 : vector<32x32xf32>
    %78 = vector.shape_cast %77 : vector<32x32xf32> to vector<4x8x32xf32>
    %c0_43 = arith.constant 0 : index
    %c0_44 = arith.constant 0 : index
    %c0_45 = arith.constant 0 : index
    %c0_46 = arith.constant 0 : index
    %79 = vector.load %arg6[%c0_43, %c0_44, %c0_45, %c0_46] : memref<1x4x8x32xf32, #tpu.memory_space<vmem>>, vector<1x4x8x32xf32>
    %80 = vector.shape_cast %79 : vector<1x4x8x32xf32> to vector<4x8x32xf32>
    %81 = vector.shape_cast %78 : vector<4x8x32xf32> to vector<1x4x8x32xf32>
    tpu.vector_store %arg6[%c0_43, %c0_44, %c0_45, %c0_46], %81 {strides = array<i32>} : memref<1x4x8x32xf32, #tpu.memory_space<vmem>>, vector<1x4x8x32xf32>,
    return
  }
  func.func @transform_0(%arg0: i32, %arg1: i32) -> (i32, i32, i32, i32) {
    %c0_i32 = arith.constant 0 : i32
    %c0_i32_0 = arith.constant 0 : i32
    %c0_i32_1 = arith.constant 0 : i32
    %c0_i32_2 = arith.constant 0 : i32
    return %arg0, %c0_i32, %c0_i32_0, %c0_i32_1 : i32, i32, i32, i32
  }
  func.func @transform_1(%arg0: i32, %arg1: i32) -> (i32, i32, i32) {
    %c0_i32 = arith.constant 0 : i32
    %c0_i32_0 = arith.constant 0 : i32
    %c0_i32_1 = arith.constant 0 : i32
    %c0_i32_2 = arith.constant 0 : i32
    return %c0_i32, %c0_i32_0, %c0_i32_1 : i32, i32, i32
  }
  func.func @transform_2(%arg0: i32, %arg1: i32) -> (i32, i32) {
    %c0_i32 = arith.constant 0 : i32
    %c0_i32_0 = arith.constant 0 : i32
    %c0_i32_1 = arith.constant 0 : i32
    return %c0_i32, %c0_i32_0 : i32, i32
  }
  func.func @transform_3(%arg0: i32, %arg1: i32) -> (i32, i32, i32, i32) {
    %c0_i32 = arith.constant 0 : i32
    %c0_i32_0 = arith.constant 0 : i32
    %c0_i32_1 = arith.constant 0 : i32
    return %arg0, %arg1, %c0_i32, %c0_i32_0 : i32, i32, i32, i32
  }
  func.func @transform_4(%arg0: i32, %arg1: i32) -> (i32, i32, i32, i32) {
    %c0_i32 = arith.constant 0 : i32
    %c0_i32_0 = arith.constant 0 : i32
    %c0_i32_1 = arith.constant 0 : i32
    return %arg0, %arg1, %c0_i32, %c0_i32_0 : i32, i32, i32, i32
  }
}

</mosaic_0001>

<bundles_post_ra>
// kernel: linknet_encoder_forward.4
= control target key start
LH: loop header
LB: loop body
LE: loop exit
PB: predicated region body
PF: predicated region fallthrough
CT: control target
= control target key end

     0   :  { %s744_s18 = smov 0   ;;  %s818_s0 = inlined_call_operand.vmem [shape: bf16[128,36], index: 0, kind: input, shape index: {}]   ;;  %s819_s1 = inlined_call_operand.vmem [shape: bf16[36,64], index: 1, kind: input, shape index: {}]   ;;  %s820_s2 = inlined_call_operand.vmem [shape: f32[1,32], index: 2, kind: input, shape index: {}]   ;;  %s821_s3 = inlined_call_operand.vmem [shape: f32[1,32], index: 3, kind: input, shape index: {}]   ;;  %s822_s4 = inlined_call_operand.vmem [shape: bf16[128,32], index: 4, kind: output, shape index: {0}]   ;;  %s823_s5 = inlined_call_operand.vmem [shape: bf16[128,32], index: 5, kind: output, shape index: {1}]  }
   0x1 LB: > { %s600_s19 = sadd.s32 4294967295, %s710_s18   ;;  %p604_p0 = scmp.ge.s32.totalorder %s710_s18, 1  ;;  %s710_s18 = sphi %s744_s18, %s16_s18  }
   0x2   : > { %p191_p1 = scmp.lt.s32.totalorder %s710_s18, 3 }
   0x4   : > { %p192_p2 = pnand %p604_p0, %p191_p1 }
   0x5   : > { %v697_v0 = vld [vmem:[%s819_s1] sm:$0xff] (!%p192_p2)   ;;  %v698_v1 = vld [vmem:[%s819_s1 + $0x8] sm:$0xff] (!%p192_p2)   ;;  %s605_s24 = sshll.u32 (!%p192_p2), %s600_s19, 3  ;;  %v699_v3 = vld [vmem:[%s819_s1 + $0x10] ss:$0 sps:$4 sm:$0x33] (!%p192_p2)  }
   0x6   : > { %195 = sbr.rel (%p192_p2) target bundleno = 367 (0x16f), region = 36  ;;  %665 = vmatprep.subr.bf16.mxu0 (!%p192_p2), %v697_v0  ;;  %679 = vmatprep.subr.bf16.mxu1 (!%p192_p2), %v697_v0  ;;  %p225_p3 = scmp.lt.s32.totalorder (!%p192_p2), %s605_s24, 15  ;;  %v623_v2 = vld [vmem:[%s821_s3] ss:$0 sm:$0xff] (!%p192_p2)  ;;  %vm304_vm0 = vcmask (!%p192_p2), 1041408   ;;  %vm291_vm1 = vcmask (!%p192_p2), 293888  }
   0x7   : > { %666 = vmatpush3.bf16.msra.mxu0 (!%p192_p2), %v697_v0  ;;  %682 = vmatpush3.bf16.msra.mxu1 (!%p192_p2), %v697_v0  ;;  %s712_s29 = smov (!%p192_p2), 32   ;;  %v306_v4 = vsel (!%p192_p2), %vm304_vm0, %v699_v3, 0  ;;  %v622_v9 = vld [vmem:[%s820_s2] ss:$0 sm:$0xff] (!%p192_p2)  ;;  %vm445_vm2 = vcmask (!%p192_p2), 257024   ;;  %s713_s14 = smov (!%p192_p2), 96  }
   0x8   : > { %667 = vmatprep.subr.bf16.mxu0 (!%p192_p2), %v698_v1  ;;  %680 = vmatprep.subr.bf16.mxu1 (!%p192_p2), %v698_v1 }
   0x9   : > { %402 = vrot.lane.b32.xlu0 (!%p192_p2), %v623_v2, %s712_s29 }
   0xb   : > { %668 = vmatpush3.bf16.msra.mxu0 (!%p192_p2), %v698_v1  ;;  %683 = vmatpush3.bf16.msra.mxu1 (!%p192_p2), %v698_v1 }
   0xc   : > { %685 = vmatprep.subr.msk.bf16.mxu0 (!%p192_p2), %vm304_vm0, %v699_v3  ;;  %686 = vmatprep.subr.msk.bf16.mxu1 (!%p192_p2), %vm304_vm0, %v699_v3 }
   0xd   : > { %s825_s24 = smov (!%p225_p3, %s605_s24), 15 }
   0xe   : > { %s764_s30 = sshll.u32 %s825_s24, 2 }
   0xf   : > { %s228_s8 = scalar_lea.vmem %s818_s0, %s764_s30  ;;  %670 = vmatpush3.bf16.msra.mxu0 %v306_v4  ;;  %684 = vmatpush3.bf16.msra.mxu1 %v306_v4  ;;  %s777_s13 = scalar_lea.vmem %s822_s4, %s764_s30 }
  0x10   : > { %v700_v5 = vld [vmem:[%s228_s8] sm:$0xff]   ;;  %v701_v6 = vld [vmem:[%s228_s8 + $0x10] sm:$0xff]   ;;  %v702_v7 = vld [vmem:[%s228_s8 + $0x8] sm:$0xff]   ;;  %s240_s17 = scalar_lea.vmem %s823_s5, %s764_s30 }
  0x11   : > { %671 = vmatprep.mubr.msk.bf16.mxu0 %vm291_vm1, %v700_v5  ;;  %v703_v8 = vld [vmem:[%s228_s8 + $0x18] sm:$0xff]   ;;  %675 = vmatprep.mubr.msk.bf16.mxu1 %vm291_vm1, %v701_v6 }
  0x12   : > { %672 = vmatmul.mubr.msk.bf16.vlgmr.msra.gmra.mrb[0].mxu0 %vm291_vm1, %v702_v7  ;;  %676 = vmatmul.mubr.msk.bf16.vlgmr.msra.gmra.mrb[0].mxu1 %vm291_vm1, %v703_v8 }
  0x7b   : > { %v403_v10 = vpop.permute.xlu0 %402 }
  0xe5   : > { %v673_v11 = vpop.f32.mrb[0].mxu0  ;;  %v677_v12 = vpop.f32.mrb[0].mxu1 }
  0xe6   : > { %v382_v13 = vadd.f32 %v673_v11, %v622_v9  ;;  %v386_v14 = vadd.f32 %v677_v12, %v622_v9  ;;  %v342_v15 = vpop.f32.mrb[1].mxu0  ;;  %v358_v16 = vpop.f32.mrb[1].mxu1  ;;  %v407_v27 = vadd.f32 %v673_v11, %v403_v10  ;;  %v411_v56 = vadd.f32 %v677_v12, %v403_v10 }
  0xe7   : > { %v380_v17 = vadd.f32 %v622_v9, %v342_v15  ;;  %v405_v18 = vadd.f32 %v403_v10, %v342_v15  ;;  %v384_v19 = vadd.f32 %v622_v9, %v358_v16  ;;  %v674_v20 = vpop.f32.mrb[2].mxu0  ;;  %v678_v21 = vpop.f32.mrb[2].mxu1  ;;  %v409_v44 = vadd.f32 %v403_v10, %v358_v16 }
  0xe8   : > { %v390_v22 = vmax.f32 %v382_v13, 0.0  ;;  %v394_v23 = vmax.f32 %v386_v14, 0.0  ;;  %v383_v24 = vadd.f32 %v674_v20, %v622_v9  ;;  %v345_v25 = vpop.f32.mrb[3].mxu0  ;;  %v361_v26 = vpop.f32.mrb[3].mxu1  ;;  %v408_v34 = vadd.f32 %v674_v20, %v403_v10 }
  0xe9   : > { %v388_v28 = vmax.f32 %v380_v17, 0.0  ;;  %v650_v29 = vpack.c.bf16 %v405_v18, %v405_v18  ;;  %v392_v30 = vmax.f32 %v384_v19, 0.0  ;;  %v387_v37 = vadd.f32 %v678_v21, %v622_v9 }
  0xea   : > { %v644_v31 = vpack.c.bf16 %v390_v22, %v390_v22  ;;  %v648_v32 = vpack.c.bf16 %v394_v23, %v394_v23  ;;  %v391_v33 = vmax.f32 %v383_v24, 0.0  ;;  %v381_v39 = vadd.f32 %v622_v9, %v345_v25 }
  0xeb   : > { %v642_v35 = vpack.c.bf16 %v388_v28, %v388_v28  ;;  %v646_v36 = vpack.c.bf16 %v392_v30, %v392_v30  ;;  %478 = vrot.lane.b32.xlu0 %v650_v29, %s713_s14  ;;  %v653_v40 = vpack.c.bf16 %v408_v34, %v408_v34  ;;  %v395_v41 = vmax.f32 %v387_v37, 0.0 }
  0xec   : > { %448 = vst.msk [vmem:[%s777_s13 + $0x8] sm:$0xf] %vm445_vm2, %v644_v31  ;;  %452 = vst.msk [vmem:[%s777_s13 + $0x18] sm:$0xf] %vm445_vm2, %v648_v32  ;;  %v645_v38 = vpack.c.bf16 %v391_v33, %v391_v33  ;;  %v385_v42 = vadd.f32 %v622_v9, %v361_v26  ;;  %v410_v43 = vadd.f32 %v403_v10, %v361_v26  ;;  %v389_v45 = vmax.f32 %v381_v39, 0.0 }
  0xed   : > { %446 = vst.msk [vmem:[%s777_s13] sm:$0xf] %vm445_vm2, %v642_v35  ;;  %450 = vst.msk [vmem:[%s777_s13 + $0x10] sm:$0xf] %vm445_vm2, %v646_v36  ;;  %v652_v46 = vpack.c.bf16 %v407_v27, %v407_v27  ;;  %v649_v47 = vpack.c.bf16 %v395_v41, %v395_v41  ;;  %v412_v50 = vadd.f32 %v678_v21, %v403_v10 }
  0xee   : > { %449 = vst.msk [vmem:[%s777_s13 + $0xc] sm:$0xf] %vm445_vm2, %v645_v38  ;;  %v393_v48 = vmax.f32 %v385_v42, 0.0  ;;  %v643_v49 = vpack.c.bf16 %v389_v45, %v389_v45  ;;  %v655_v52 = vpack.c.bf16 %v410_v43, %v410_v43  ;;  %v654_v53 = vpack.c.bf16 %v409_v44, %v409_v44 }
  0xef   : > { %484 = vrot.lane.b32.xlu0 %v653_v40, %s713_s14  ;;  %482 = vrot.lane.b32.xlu1 %v652_v46, %s713_s14  ;;  %453 = vst.msk [vmem:[%s777_s13 + $0x1c] sm:$0xf] %vm445_vm2, %v649_v47  ;;  %v406_v54 = vadd.f32 %v403_v10, %v345_v25  ;;  %v657_v55 = vpack.c.bf16 %v412_v50, %v412_v50 }
  0xf0   : > { %v647_v51 = vpack.c.bf16 %v393_v48, %v393_v48  ;;  %447 = vst.msk [vmem:[%s777_s13 + $0x4] sm:$0xf] %vm445_vm2, %v643_v49  ;;  %v656_v58 = vpack.c.bf16 %v411_v56, %v411_v56 }
  0xf1   : > { %v651_v57 = vpack.c.bf16 %v406_v54, %v406_v54 }
  0xf2   : > { %451 = vst.msk [vmem:[%s777_s13 + $0x14] sm:$0xf] %vm445_vm2, %v647_v51 }
  0xf3   : > { %488 = vrot.lane.b32.xlu0 %v655_v52, %s713_s14  ;;  %486 = vrot.lane.b32.xlu1 %v654_v53, %s713_s14 }
  0xf7   : > { %492 = vrot.lane.b32.xlu0 %v657_v55, %s713_s14  ;;  %480 = vrot.lane.b32.xlu1 %v651_v57, %s713_s14 }
  0xfb   : > { %490 = vrot.lane.b32.xlu1 %v656_v58, %s713_s14 }
 0x15d   : > { %v479_v59 = vpop.permute.xlu0 %478 }
 0x15e   : > { %502 = vst.msk [vmem:[%s240_s17] sm:$0xf] %vm445_vm2, %v479_v59 }
 0x161   : > { %v485_v60 = vpop.permute.xlu0 %484  ;;  %v483_v61 = vpop.permute.xlu1 %482 }
 0x162   : > { %505 = vst.msk [vmem:[%s240_s17 + $0xc] sm:$0xf] %vm445_vm2, %v485_v60  ;;  %504 = vst.msk [vmem:[%s240_s17 + $0x8] sm:$0xf] %vm445_vm2, %v483_v61 }
 0x165   : > { %v489_v62 = vpop.permute.xlu0 %488  ;;  %v487_v63 = vpop.permute.xlu1 %486 }
 0x166   : > { %507 = vst.msk [vmem:[%s240_s17 + $0x14] sm:$0xf] %vm445_vm2, %v489_v62  ;;  %506 = vst.msk [vmem:[%s240_s17 + $0x10] sm:$0xf] %vm445_vm2, %v487_v63 }
 0x169   : > { %v493_v0 = vpop.permute.xlu0 %492  ;;  %v481_v1 = vpop.permute.xlu1 %480 }
 0x16a   : > { %509 = vst.msk [vmem:[%s240_s17 + $0x1c] sm:$0xf] %vm445_vm2, %v493_v0  ;;  %503 = vst.msk [vmem:[%s240_s17 + $0x4] sm:$0xf] %vm445_vm2, %v481_v1 }
 0x16d   : > { %v491_v2 = vpop.permute.xlu1 %490 }
 0x16e   : > { %508 = vst.msk [vmem:[%s240_s17 + $0x18] sm:$0xf] %vm445_vm2, %v491_v2 }
 0x16f PF: > { %s16_s18 = sadd.s32 1, %s710_s18  }
 0x170   : > { %p13_p4 = scmp.ge.s32.totalorder %s16_s18, 4  }
 0x172   :  { %15 = sbr.rel (!%p13_p4) target bundleno = 1 (0x1), region = 78 }

// kernel: linknet_encoder_forward.6
= control target key start
LH: loop header
LB: loop body
LE: loop exit
PB: predicated region body
PF: predicated region fallthrough
CT: control target
= control target key end

     0   :  { %s1727_s12 = smov 0   ;;  %s1729_s13 = smov 0   ;;  %s2067_s0 = inlined_call_operand.vmem [shape: bf16[2,10,10,32], index: 0, kind: input, shape index: {}]   ;;  %s2068_s1 = inlined_call_operand.vmem [shape: bf16[9,32,32], index: 1, kind: input, shape index: {}]   ;;  %s2069_s2 = inlined_call_operand.vmem [shape: f32[1,32], index: 2, kind: input, shape index: {}]   ;;  %s2070_s3 = inlined_call_operand.vmem [shape: bf16[2,8,8,32], index: 3, kind: output, shape index: {}]  }
   0x1   :  { %s1731_s14 = smov 0   ;;  %s1733_s15 = smov 0  }
   0x2   :  { %s1735_s16 = smov 0  }
   0x3 LB: > { %s22_s17 = sadd.s32 1, %s1697_s14  ;;  %s25_s18 = sadd.s32 1, %s1701_s15  ;;  %s1705_s16 = sphi %s1735_s16, %s13_s16   ;;  %s1701_s15 = sphi %s1733_s15, %s2078_s15   ;;  %s1697_s14 = sphi %s1731_s14, %s2077_s14   ;;  %s1693_s13 = sphi %s1729_s13, %s2076_s13   ;;  %s1689_s12 = sphi %s1727_s12, %s2075_s12  }
   0x4   : > { %p23_p0 = scmp.ge.s32.totalorder %s22_s17, 2  ;;  %p1329_p1 = scmp.ge.s32.totalorder %s1705_s16, 1 }
   0x5   : > { %p151_p2 = scmp.lt.s32.totalorder %s1705_s16, 5 }
   0x6   : > { %s2080_s17 = smov (%p23_p0, %s22_s17), 0  ;;  %s2082_s18 = smov (!%p23_p0, %s25_s18), %s1701_s15 }
   0x7   : > { %p152_p3 = pnand %p1329_p1, %p151_p2  ;;  %p27_p4 = scmp.ge.s32.totalorder %s2082_s18, 2 }
   0x8   : > { %v1643_v0 = vld [vmem:[%s2068_s1 + $0x40] sm:$0xff] (!%p152_p3)   ;;  %p179_p5 = scmp.lt.s32.totalorder (!%p152_p3), %s1693_s13, 1  ;;  %v1644_v1 = vld [vmem:[%s2068_s1 + $0x10] sm:$0xff] (!%p152_p3)   ;;  %v1645_v2 = vld [vmem:[%s2068_s1 + $0x48] sm:$0xff] (!%p152_p3)   ;;  %s1459_s28 = sshll.u32 (!%p152_p3), %s1689_s12, 5  ;;  %vm293_vm3 = vcmask (!%p152_p3), 261120  }
   0x9   : > { %s2084_s18 = smov (%p27_p4, %s2082_s18), 0  ;;  %155 = sbr.rel (%p152_p3) target bundleno = 320 (0x140), region = 32 }
   0xa   : > { %1530 = vmatprep.subr.bf16.mxu0 (!%p152_p3), %v1643_v0  ;;  %1498 = vmatprep.subr.bf16.mxu1 (!%p152_p3), %v1644_v1  ;;  %v1646_v3 = vld [vmem:[%s2068_s1 + $0x18] sm:$0xff] (!%p152_p3)   ;;  %v1778_v4 = vld [vmem:[%s2068_s1 + $0x50] sm:$0xff] (!%p152_p3)   ;;  %v1786_v5 = vld [vmem:[%s2068_s1] sm:$0xff] (!%p152_p3)   ;;  %vm211_vm0 = vsmask.f32 (!%p152_p3), 3328  ;;  %vm430_vm4 = vcmask (!%p152_p3), 1042432  }
   0xb   : > { %1531 = vmatpush3.bf16.msra.mxu0 (!%p152_p3), %v1643_v0  ;;  %1499 = vmatpush3.bf16.msra.mxu1 (!%p152_p3), %v1644_v1  ;;  %vm212_vm1 = vsmask.f32 (!%p152_p3), 7440  ;;  %vm431_vm5 = vcmask (!%p152_p3), 1046532   ;;  %s1331_s21 = sshll.u32 (!%p152_p3), %s1689_s12, 2  ;;  %vm1226_vm7 = vcmask (!%p152_p3), 257024  }
   0xc   : > { %1532 = vmatprep.subr.bf16.mxu0 (!%p152_p3), %v1645_v2  ;;  %1500 = vmatprep.subr.bf16.mxu1 (!%p152_p3), %v1646_v3  ;;  %vm1827_vm2 = vmor (!%p152_p3), %vm211_vm0, %vm212_vm1  ;;  %p187_p6 = scmp.lt.s32.totalorder (!%p152_p3), %s1331_s21, 7 }
   0xd   : > { %vm1888_vm6 = vmor (!%p152_p3), %vm430_vm4, %vm431_vm5 }
   0xf   : > { %1533 = vmatpush3.bf16.msra.mxu0 (!%p152_p3), %v1645_v2  ;;  %1501 = vmatpush3.bf16.msra.mxu1 (!%p152_p3), %v1646_v3 }
  0x10   : > { %s2086_s13 = smov (!%p179_p5, %s1693_s13), 1  ;;  %1538 = vmatprep.subr.bf16.mxu0 %v1778_v4  ;;  %1506 = vmatprep.subr.bf16.mxu1 %v1786_v5  ;;  %s2088_s21 = smov (!%p187_p6, %s1331_s21), 7 }
  0x11   : > { %s1602_s27 = smul.u32 80, %s2086_s13  ;;  %s1332_s22 = sshll.u32 %s2086_s13, 3 }
  0x12   : > { %s190_s23 = sadd.s32 %s1332_s22, %s2088_s21 }
  0x13   : > { %s183_s6 = scalar_lea.vmem %s2067_s0, %s1602_s27  ;;  %s1333_s26 = sshll.u32 %s190_s23, 2 }
  0x14   : > { %s1788_s9 = scalar_lea.vmem %s183_s6, %s1459_s28  ;;  %s192_s27 = scalar_lea.vmem %s2070_s3, %s1333_s26 }
  0x15   : > { %v1791_v6 = vld [vmem:[%s1788_s9] sm:$0xf]  ;;  %v1794_v7 = vld [vmem:[%s1788_s9 + $0x4] sm:$0x1]  ;;  %v1797_v8 = vld [vmem:[%s1788_s9 + $0x8] sm:$0xf] }
  0x16   : > { %v1801_v9 = vld [vmem:[%s1788_s9 + $0xc] sm:$0x1]  ;;  %v215_v10 = vshrl.u32 %v1791_v6, 16  ;;  %v218_v11 = vshll.u32 %v1791_v6, 16  ;;  %v224_v12 = vshll.u32 %v1794_v7, 16  ;;  %v229_v13 = vshrl.u32 %v1797_v8, 16 }
  0x17   : > { %v232_v14 = vshll.u32 %v1797_v8, 16  ;;  %v238_v15 = vshll.u32 %v1801_v9, 16  ;;  %v1811_v16 = vld [vmem:[%s1788_s9 + $0x8] sm:$0xf]  ;;  %v1814_v21 = vld [vmem:[%s1788_s9 + $0xc] sm:$0x1] }
  0x18   : > { %v217_v17 = vrot.slane %v215_v10, 4  ;;  %v220_v18 = vrot.slane %v218_v11, 5  ;;  %v226_v19 = vrot.slane %v224_v12, 5  ;;  %v231_v20 = vrot.slane %v229_v13, 4  ;;  %v1817_v24 = vld [vmem:[%s1788_s9 + $0x10] sm:$0xf] }
  0x19   : > { %v234_v22 = vrot.slane %v232_v14, 5  ;;  %v240_v23 = vrot.slane %v238_v15, 5  ;;  %v1820_v25 = vld [vmem:[%s1788_s9 + $0x14] sm:$0x1]  ;;  %v630_v27 = vshrl.u32 %v1811_v16, 16  ;;  %v633_v28 = vshll.u32 %v1811_v16, 16 }
  0x1a   : > { %v221_v26 = vor.u32 %v220_v18, %v217_v17  ;;  %v639_v29 = vshll.u32 %v1814_v21, 16  ;;  %v644_v32 = vshrl.u32 %v1817_v24, 16  ;;  %v647_v33 = vshll.u32 %v1817_v24, 16  ;;  %v1835_v35 = vld [vmem:[%s1788_s9 + $0x10] sm:$0xf] }
  0x1b   : > { %v235_v31 = vor.u32 %v234_v22, %v231_v20  ;;  %v653_v34 = vshll.u32 %v1820_v25, 16  ;;  %v632_v37 = vrot.slane %v630_v27, 4  ;;  %v635_v38 = vrot.slane %v633_v28, 5  ;;  %v1838_v39 = vld [vmem:[%s1788_s9 + $0x14] sm:$0x1] }
  0x1c   : > { %v222_v36 = vrot.slane %v221_v26, 4  ;;  %v646_v41 = vrot.slane %v644_v32, 4  ;;  %v649_v42 = vrot.slane %v647_v33, 5  ;;  %v1841_v43 = vld [vmem:[%s1788_s9 + $0x18] sm:$0xf]  ;;  %v641_v46 = vrot.slane %v639_v29, 5 }
  0x1d   : > { %v236_v40 = vrot.slane %v235_v31, 4  ;;  %v636_v45 = vor.u32 %v635_v38, %v632_v37  ;;  %v655_v47 = vrot.slane %v653_v34, 5  ;;  %v1848_v50 = vld [vmem:[%s1788_s9 + $0x1c] sm:$0x1]  ;;  %v243_v51 = vshrl.u32 %v1835_v35, 16 }
  0x1e   : > { %v227_v44 = vsel %vm1827_vm2, %v222_v36, %v226_v19  ;;  %v650_v49 = vor.u32 %v649_v42, %v646_v41  ;;  %v246_v52 = vshll.u32 %v1835_v35, 16  ;;  %v1853_v53 = vld [vmem:[%s1788_s9 + $0x18] sm:$0xf]  ;;  %v252_v56 = vshll.u32 %v1838_v39, 16  ;;  %v1858_v58 = vld [vmem:[%s1788_s9 + $0x1c] sm:$0x1] }
  0x1f   : > { %v241_v48 = vsel %vm1827_vm2, %v236_v40, %v240_v23  ;;  %v637_v55 = vrot.slane %v636_v45, 4  ;;  %v257_v57 = vshrl.u32 %v1841_v43, 16  ;;  %v245_v60 = vrot.slane %v243_v51, 4  ;;  %v1862_v63 = vld [vmem:[%s1788_s9 + $0x20] sm:$0xf] }
  0x20   : > { %v1341_v54 = vcombine.low %v227_v44, %v241_v48  ;;  %v651_v59 = vrot.slane %v650_v49, 4  ;;  %v248_v61 = vrot.slane %v246_v52, 5  ;;  %v260_v62 = vshll.u32 %v1841_v43, 16  ;;  %v1869_v3 = vld [vmem:[%s1788_s9 + $0x24] sm:$0x1] }
  0x21   : > { %v642_v0 = vsel %vm1827_vm2, %v637_v55, %v641_v46  ;;  %v259_v1 = vrot.slane %v257_v57, 4  ;;  %v266_v2 = vshll.u32 %v1848_v50, 16  ;;  %v254_v12 = vrot.slane %v252_v56, 5 }
  0x22   : > { %1502 = vmatprep.mubr.msk.bf16.mxu1 %vm293_vm3, %v1341_v54  ;;  %v656_v10 = vsel %vm1827_vm2, %v651_v59, %v655_v47  ;;  %v249_v11 = vor.u32 %v248_v61, %v245_v60  ;;  %v262_v13 = vrot.slane %v260_v62, 5  ;;  %v658_v17 = vshrl.u32 %v1853_v53, 16  ;;  %v1649_v62 = vld [vmem:[%s2068_s1 + $0x58] sm:$0xff]  }
  0x23   : > { %v1391_v14 = vcombine.low %v642_v0, %v656_v10  ;;  %v268_v15 = vrot.slane %v266_v2, 5  ;;  %v661_v20 = vshll.u32 %v1853_v53, 16  ;;  %v667_v22 = vshll.u32 %v1858_v58, 16  ;;  %v1652_v0 = vld [vmem:[%s2068_s1 + $0x60] sm:$0xff]  }
  0x24   : > { %v250_v18 = vrot.slane %v249_v11, 4  ;;  %v263_v19 = vor.u32 %v262_v13, %v259_v1  ;;  %v660_v23 = vrot.slane %v658_v17, 4  ;;  %v672_v26 = vshrl.u32 %v1862_v63, 16  ;;  %v1938_v11 = vld [vmem:[%s1788_s9 + $0x18] sm:$0xf] }
  0x25   : > { %1534 = vmatprep.mubr.msk.bf16.mxu0 %vm293_vm3, %v1391_v14  ;;  %v675_v27 = vshll.u32 %v1862_v63, 16  ;;  %v681_v28 = vshll.u32 %v1869_v3, 16  ;;  %v773_v29 = vrot.slane %v1814_v21, 5  ;;  %v663_v33 = vrot.slane %v661_v20, 5  ;;  %v1656_v20 = vld [vmem:[%s2068_s1 + $0x28] sm:$0xff]  }
  0x26   : > { %v255_v31 = vsel %vm1827_vm2, %v250_v18, %v254_v12  ;;  %v264_v32 = vrot.slane %v263_v19, 4  ;;  %v777_v34 = vrot.slane %v1820_v25, 5  ;;  %v674_v36 = vrot.slane %v672_v26, 4  ;;  %v1650_v25 = vld [vmem:[%s2068_s1 + $0x8] sm:$0xff]  }
  0x27   : > { %v677_v37 = vrot.slane %v675_v27, 5  ;;  %v1347_v38 = vcombine.low %v1791_v6, %v1797_v8  ;;  %v664_v41 = vor.u32 %v663_v33, %v660_v23  ;;  %v669_v42 = vrot.slane %v667_v22, 5 }
  0x28   : > { %v269_v21 = vsel %vm1827_vm2, %v264_v32, %v268_v15  ;;  %v1397_v44 = vrot.slane %v1811_v16, 9  ;;  %v683_v47 = vrot.slane %v681_v28, 5  ;;  %v1398_v48 = vrot.slane %v1817_v24, 9 }
  0x29   : > { %v1342_v45 = vcombine.low %v255_v31, %v269_v21  ;;  %v678_v46 = vor.u32 %v677_v37, %v674_v36  ;;  %v665_v49 = vrot.slane %v664_v41, 4  ;;  %v435_v52 = vrot.slane %v1794_v7, 5  ;;  %v1959_v31 = vld [vmem:[%s1788_s9 + $0x1c] sm:$0x1]  ;;  %v1655_v37 = vld [vmem:[%s2068_s1 + $0x68] sm:$0xff]  }
  0x2a   : > { %v774_v51 = vsel %vm1888_vm6, %v1397_v44, %v773_v29  ;;  %v439_v54 = vrot.slane %v1801_v9, 5  ;;  %v778_v56 = vsel %vm1888_vm6, %v1398_v48, %v777_v34  ;;  %v1353_v59 = vrot.slane %v1791_v6, 9  ;;  %v1956_v29 = vld [vmem:[%s1788_s9 + $0x14] sm:$0x1]  ;;  %v1984_v44 = vld [vmem:[%s1788_s9 + $0x28] sm:$0xf] }
  0x2b   : > { %1503 = vmatmul.mubr.msk.bf16.vlgmr.msra.gmra.mrb[0].mxu1 %vm293_vm3, %v1342_v45  ;;  %v679_v55 = vrot.slane %v678_v46, 4  ;;  %v670_v57 = vsel %vm1827_vm2, %v665_v49, %v669_v42  ;;  %v1354_v60 = vrot.slane %v1797_v8, 9  ;;  %v1405_v9 = vcombine.low %v774_v51, %v778_v56  ;;  %v1658_v49 = vld [vmem:[%s2068_s1 + $0x70] sm:$0xff]  }
  0x2c   : > { %1507 = vmatpush3.bf16.msra.mxu1 %v1786_v5  ;;  %1510 = vmatprep.mubr.msk.bf16.mxu1 %vm293_vm3, %v1347_v38  ;;  %v1654_v5 = vld [vmem:[%s2068_s1 + $0x20] sm:$0xff]   ;;  %v781_v6 = vrot.slane %v1858_v58, 5  ;;  %v785_v8 = vrot.slane %v1869_v3, 5  ;;  %v1399_v1 = vrot.slane %v1853_v53, 9  ;;  %v1400_v2 = vrot.slane %v1862_v63, 9 }
  0x2d   : > { %v684_v7 = vsel %vm1827_vm2, %v679_v55, %v683_v47  ;;  %1508 = vmatprep.subr.bf16.mxu1 %v1650_v25  ;;  %v436_v10 = vsel %vm1888_vm6, %v1353_v59, %v435_v52  ;;  %v440_v58 = vsel %vm1888_vm6, %v1354_v60, %v439_v54  ;;  %v1935_v3 = vld [vmem:[%s1788_s9 + $0x10] sm:$0xf]  ;;  %v982_v13 = vshrl.u32 %v1938_v11, 16  ;;  %v1418_v60 = vld [vmem:[%s1788_s9 + $0x24] sm:$0x1] }
  0x2e   : > { %v1392_v61 = vcombine.low %v670_v57, %v684_v7  ;;  %v971_v12 = vshll.u32 %v1935_v3, 16  ;;  %v985_v14 = vshll.u32 %v1938_v11, 16  ;;  %v1348_v15 = vcombine.low %v1835_v35, %v1841_v43  ;;  %v1662_v57 = vld [vmem:[%s2068_s1 + $0x38] sm:$0xff]  }
  0x2f   : > { %v1361_v17 = vcombine.low %v436_v10, %v440_v58  ;;  %v782_v18 = vsel %vm1888_vm6, %v1399_v1, %v781_v6  ;;  %v786_v19 = vsel %vm1888_vm6, %v1400_v2, %v785_v8  ;;  %v984_v26 = vrot.slane %v982_v13, 4  ;;  %v1420_v8 = vld [vmem:[%s1788_s9 + $0x2c] sm:$0x1]  ;;  %v1661_v58 = vld [vmem:[%s2068_s1 + $0x78] sm:$0xff]  }
  0x30   : > { %1535 = vmatmul.mubr.msk.bf16.vlgmr.msra.gmra.mrb[0].mxu0 %vm293_vm3, %v1392_v61  ;;  %1509 = vmatpush3.bf16.msra.mxu1 %v1650_v25  ;;  %v973_v23 = vrot.slane %v971_v12, 5  ;;  %v987_v27 = vrot.slane %v985_v14, 5  ;;  %v443_v28 = vrot.slane %v1838_v39, 5  ;;  %v447_v32 = vrot.slane %v1848_v50, 5  ;;  %v1660_v50 = vld [vmem:[%s2068_s1 + $0x30] sm:$0xff]  }
  0x31   : > { %1539 = vmatpush3.bf16.msra.mxu0 %v1778_v4  ;;  %1542 = vmatprep.mubr.msk.bf16.mxu0 %vm293_vm3, %v1405_v9  ;;  %v968_v4 = vshrl.u32 %v1935_v3, 16  ;;  %v1406_v33 = vcombine.low %v782_v18, %v786_v19  ;;  %v1355_v34 = vrot.slane %v1835_v35, 9  ;;  %v1356_v36 = vrot.slane %v1841_v43, 9  ;;  %v1981_v25 = vld [vmem:[%s1788_s9 + $0x20] sm:$0xf] }
  0x32   : > { %1540 = vmatprep.subr.bf16.mxu0 %v1649_v62  ;;  %1514 = vmatprep.subr.bf16.mxu1 %v1654_v5  ;;  %v1425_v39 = vcombine.low %v1935_v3, %v1938_v11  ;;  %v977_v21 = vshll.u32 %v1956_v29, 16  ;;  %v988_v41 = vor.u32 %v987_v27, %v984_v26  ;;  %v991_v35 = vshll.u32 %v1959_v31, 16 }
  0x33   : > { %v970_v22 = vrot.slane %v968_v4, 4  ;;  %v444_v43 = vsel %vm1888_vm6, %v1355_v34, %v443_v28  ;;  %v448_v42 = vsel %vm1888_vm6, %v1356_v36, %v447_v32  ;;  %v996_v45 = vshrl.u32 %v1981_v25, 16 }
  0x34   : > { %v999_v46 = vshll.u32 %v1981_v25, 16  ;;  %v1010_v47 = vshrl.u32 %v1984_v44, 16  ;;  %v1013_v48 = vshll.u32 %v1984_v44, 16  ;;  %v979_v52 = vrot.slane %v977_v21, 5  ;;  %v1455_v21 = vld [vmem:[%s2069_s2] ss:$0 sm:$0xff] }
  0x35   : > { %1541 = vmatpush3.bf16.msra.mxu0 %v1649_v62  ;;  %v974_v38 = vor.u32 %v973_v23, %v970_v22  ;;  %v989_v54 = vrot.slane %v988_v41, 4  ;;  %v993_v55 = vrot.slane %v991_v35, 5  ;;  %v1362_v56 = vcombine.low %v444_v43, %v448_v42 }
  0x36   : > { %1546 = vmatprep.subr.bf16.mxu0 %v1652_v0  ;;  %v1381_v59 = vcombine.low %v1811_v16, %v1817_v24  ;;  %v998_v7 = vrot.slane %v996_v45, 4  ;;  %v1001_v9 = vrot.slane %v999_v46, 5  ;;  %v1012_v61 = vrot.slane %v1010_v47, 4 }
  0x37   : > { %1511 = vmatmul.mubr.msk.bf16.vlgmr.msra.gmra.mrb[0].mxu1 %vm293_vm3, %v1348_v15  ;;  %v975_v51 = vrot.slane %v974_v38, 4  ;;  %v1015_v62 = vrot.slane %v1013_v48, 5  ;;  %v994_v6 = vsel %vm1827_vm2, %v989_v54, %v993_v55  ;;  %v1005_v16 = vshll.u32 %v1418_v60, 16  ;;  %v1664_v15 = vld [vmem:[%s2068_s1 + $0x80] sm:$0xff]  }
  0x38   : > { %1515 = vmatpush3.bf16.msra.mxu1 %v1654_v5  ;;  %1518 = vmatprep.mubr.msk.bf16.mxu1 %vm293_vm3, %v1361_v17  ;;  %v1002_v1 = vor.u32 %v1001_v9, %v998_v7  ;;  %v1019_v10 = vshll.u32 %v1420_v8, 16  ;;  %v1441_v17 = vrot.slane %v1935_v3, 9  ;;  %v1111_v18 = vrot.slane %v1956_v29, 5 }
  0x39   : > { %1516 = vmatprep.subr.bf16.mxu1 %v1656_v20  ;;  %v980_v5 = vsel %vm1827_vm2, %v975_v51, %v979_v52  ;;  %v1016_v2 = vor.u32 %v1015_v62, %v1012_v61  ;;  %v1007_v12 = vrot.slane %v1005_v16, 5  ;;  %v1442_v19 = vrot.slane %v1938_v11, 9 }
  0x3a   : > { %v1435_v24 = vcombine.low %v980_v5, %v994_v6  ;;  %v1003_v4 = vrot.slane %v1002_v1, 4  ;;  %v1021_v14 = vrot.slane %v1019_v10, 5  ;;  %v1382_v22 = vcombine.low %v1853_v53, %v1862_v63  ;;  %v1666_v53 = vld [vmem:[%s2068_s1 + $0x88] sm:$0xff]  }
  0x3b   : > { %v1017_v13 = vrot.slane %v1016_v2, 4  ;;  %v1112_v3 = vsel %vm1888_vm6, %v1441_v17, %v1111_v18  ;;  %v1443_v30 = vrot.slane %v1981_v25, 9  ;;  %v1119_v63 = vrot.slane %v1418_v60, 5 }
  0x3c   : > { %1543 = vmatmul.mubr.msk.bf16.vlgmr.msra.gmra.mrb[0].mxu0 %vm293_vm3, %v1406_v33  ;;  %1517 = vmatpush3.bf16.msra.mxu1 %v1656_v20  ;;  %v1115_v20 = vrot.slane %v1959_v31, 5  ;;  %v1008_v23 = vsel %vm1827_vm2, %v1003_v4, %v1007_v12  ;;  %v1444_v29 = vrot.slane %v1984_v44, 9  ;;  %v1123_v31 = vrot.slane %v1420_v8, 5 }
  0x3d   : > { %1547 = vmatpush3.bf16.msra.mxu0 %v1652_v0  ;;  %1550 = vmatprep.mubr.msk.bf16.mxu0 %vm293_vm3, %v1425_v39  ;;  %v1426_v0 = vcombine.low %v1981_v25, %v1984_v44  ;;  %v1022_v26 = vsel %vm1827_vm2, %v1017_v13, %v1021_v14  ;;  %v1120_v32 = vsel %vm1888_vm6, %v1443_v30, %v1119_v63 }
  0x3e   : > { %1548 = vmatprep.subr.bf16.mxu0 %v1655_v37  ;;  %1522 = vmatprep.subr.bf16.mxu1 %v1660_v50  ;;  %v1116_v27 = vsel %vm1888_vm6, %v1442_v19, %v1115_v20  ;;  %v1436_v11 = vcombine.low %v1008_v23, %v1022_v26  ;;  %v1124_v33 = vsel %vm1888_vm6, %v1444_v29, %v1123_v31 }
  0x3f   : > { %v1449_v28 = vcombine.low %v1112_v3, %v1116_v27  ;;  %v1450_v34 = vcombine.low %v1120_v32, %v1124_v33 }
  0x41   : > { %1549 = vmatpush3.bf16.msra.mxu0 %v1655_v37 }
  0x42   : > { %1554 = vmatprep.subr.bf16.mxu0 %v1658_v49 }
  0x43   : > { %1519 = vmatmul.mubr.msk.bf16.vlgmr.msra.gmra.mrb[0].mxu1 %vm293_vm3, %v1362_v56 }
  0x44   : > { %1523 = vmatpush3.bf16.msra.mxu1 %v1660_v50  ;;  %1526 = vmatprep.mubr.msk.bf16.mxu1 %vm293_vm3, %v1381_v59 }
  0x45   : > { %1524 = vmatprep.subr.bf16.mxu1 %v1662_v57 }
  0x48   : > { %1551 = vmatmul.mubr.msk.bf16.vlgmr.msra.gmra.mrb[0].mxu0 %vm293_vm3, %v1426_v0  ;;  %1525 = vmatpush3.bf16.msra.mxu1 %v1662_v57 }
  0x49   : > { %1555 = vmatpush3.bf16.msra.mxu0 %v1658_v49  ;;  %1558 = vmatprep.mubr.msk.bf16.mxu0 %vm293_vm3, %v1435_v24 }
  0x4a   : > { %1556 = vmatprep.subr.bf16.mxu0 %v1661_v58 }
  0x4d   : > { %1557 = vmatpush3.bf16.msra.mxu0 %v1661_v58 }
  0x4e   : > { %1562 = vmatprep.subr.bf16.mxu0 %v1664_v15 }
  0x4f   : > { %1527 = vmatmul.mubr.msk.bf16.vlgmr.msra.gmra.mrb[0].mxu1 %vm293_vm3, %v1382_v22 }
  0x54   : > { %1559 = vmatmul.mubr.msk.bf16.vlgmr.msra.gmra.mrb[0].mxu0 %vm293_vm3, %v1436_v11 }
  0x55   : > { %1563 = vmatpush3.bf16.msra.mxu0 %v1664_v15  ;;  %1566 = vmatprep.mubr.msk.bf16.mxu0 %vm293_vm3, %v1449_v28 }
  0x56   : > { %1564 = vmatprep.subr.bf16.mxu0 %v1666_v53 }
  0x59   : > { %1565 = vmatpush3.bf16.msra.mxu0 %v1666_v53 }
  0x60   : > { %1567 = vmatmul.mubr.msk.bf16.vlgmr.msra.gmra.mrb[0].mxu0 %vm293_vm3, %v1450_v34 }
 0x122   : > { %v1528_v36 = vpop.f32.mrb[0].mxu1 }
 0x123   : > { %v610_v39 = vpop.f32.mrb[1].mxu1 }
 0x124   : > { %v1529_v37 = vpop.f32.mrb[2].mxu1 }
 0x125   : > { %v613_v50 = vpop.f32.mrb[3].mxu1 }
 0x133   : > { %v1568_v38 = vpop.f32.mrb[0].mxu0 }
 0x134   : > { %v1570_v41 = vadd.f32 %v1568_v38, %v1528_v36  ;;  %v1188_v40 = vpop.f32.mrb[1].mxu0 }
 0x135   : > { %v1571_v35 = vadd.f32 %v1188_v40, %v610_v39  ;;  %v1569_v43 = vpop.f32.mrb[2].mxu0 }
 0x136   : > { %v1216_v42 = vadd.f32 %v1570_v41, %v1455_v21  ;;  %v1572_v25 = vadd.f32 %v1569_v43, %v1529_v37  ;;  %v1191_v44 = vpop.f32.mrb[3].mxu0 }
 0x137   : > { %v1214_v45 = vadd.f32 %v1571_v35, %v1455_v21  ;;  %v1573_v46 = vadd.f32 %v1191_v44, %v613_v50 }
 0x138   : > { %v1220_v47 = vmax.f32 %v1216_v42, 0.0  ;;  %v1217_v48 = vadd.f32 %v1572_v25, %v1455_v21 }
 0x139   : > { %v1218_v49 = vmax.f32 %v1214_v45, 0.0  ;;  %v1215_v51 = vadd.f32 %v1573_v46, %v1455_v21 }
 0x13a   : > { %v1224_v52 = vpack.c.bf16 %v1220_v47, %v1220_v47  ;;  %v1221_v54 = vmax.f32 %v1217_v48, 0.0 }
 0x13b   : > { %v1222_v55 = vpack.c.bf16 %v1218_v49, %v1218_v49  ;;  %v1219_v56 = vmax.f32 %v1215_v51, 0.0 }
 0x13c   : > { %1229 = vst.msk [vmem:[%s192_s27 + $0x8] sm:$0xf] %vm1226_vm7, %v1224_v52  ;;  %v1225_v57 = vpack.c.bf16 %v1221_v54, %v1221_v54 }
 0x13d   : > { %1227 = vst.msk [vmem:[%s192_s27] sm:$0xf] %vm1226_vm7, %v1222_v55  ;;  %v1223_v59 = vpack.c.bf16 %v1219_v56, %v1219_v56 }
 0x13e   : > { %1230 = vst.msk [vmem:[%s192_s27 + $0xc] sm:$0xf] %vm1226_vm7, %v1225_v57 }
 0x13f   : > { %1228 = vst.msk [vmem:[%s192_s27 + $0x4] sm:$0xf] %vm1226_vm7, %v1223_v59 }
 0x140 PF: > { %s13_s16 = sadd.s32 1, %s1705_s16   ;;  %s2075_s12 = smov %s1697_s14 }
 0x141   : > { %p10_p7 = scmp.ge.s32.totalorder %s13_s16, 6   ;;  %s2076_s13 = smov %s1701_s15 }
 0x142   : > { %s2077_s14 = smov %s2080_s17  ;;  %s2078_s15 = smov %s2084_s18 }
 0x143   :  { %12 = sbr.rel (!%p10_p7) target bundleno = 3 (0x3), region = 73 }

// kernel: linknet_encoder_forward.5
= control target key start
LH: loop header
LB: loop body
LE: loop exit
PB: predicated region body
PF: predicated region fallthrough
CT: control target
= control target key end

     0   :  { %s1837_s15 = smov 0   ;;  %s1839_s16 = smov 0   ;;  %s2180_s0 = inlined_call_operand.vmem [shape: bf16[2,10,10,32], index: 0, kind: input, shape index: {}]   ;;  %s2181_s1 = inlined_call_operand.vmem [shape: bf16[9,32,32], index: 1, kind: input, shape index: {}]   ;;  %s2182_s2 = inlined_call_operand.vmem [shape: f32[1,32], index: 2, kind: input, shape index: {}]   ;;  %s2183_s3 = inlined_call_operand.vmem [shape: bf16[2,8,8,32], index: 3, kind: input, shape index: {}]   ;;  %s2184_s4 = inlined_call_operand.vmem [shape: bf16[2,8,8,32], index: 4, kind: output, shape index: {}]  }
   0x1   :  { %s1841_s17 = smov 0   ;;  %s1843_s18 = smov 0  }
   0x2   :  { %s1845_s19 = smov 0  }
   0x3 LB: > { %s23_s20 = sadd.s32 1, %s1802_s17  ;;  %s26_s21 = sadd.s32 1, %s1806_s18  ;;  %s1810_s19 = sphi %s1845_s19, %s14_s19   ;;  %s1806_s18 = sphi %s1843_s18, %s2192_s18   ;;  %s1802_s17 = sphi %s1841_s17, %s2191_s17   ;;  %s1798_s16 = sphi %s1839_s16, %s2190_s16   ;;  %s1794_s15 = sphi %s1837_s15, %s2189_s15  }
   0x4   : > { %p24_p0 = scmp.ge.s32.totalorder %s23_s20, 2  ;;  %p1422_p1 = scmp.ge.s32.totalorder %s1810_s19, 1 }
   0x5   : > { %p193_p2 = scmp.lt.s32.totalorder %s1810_s19, 5 }
   0x6   : > { %s2194_s20 = smov (%p24_p0, %s23_s20), 0  ;;  %s2196_s21 = smov (!%p24_p0, %s26_s21), %s1806_s18 }
   0x7   : > { %p194_p3 = pnand %p1422_p1, %p193_p2  ;;  %p28_p4 = scmp.ge.s32.totalorder %s2196_s21, 2 }
   0x8   : > { %v1748_v0 = vld [vmem:[%s2181_s1 + $0x40] sm:$0xff] (!%p194_p3)   ;;  %p232_p5 = scmp.lt.s32.totalorder (!%p194_p3), %s1798_s16, 1  ;;  %v1749_v1 = vld [vmem:[%s2181_s1 + $0x10] sm:$0xff] (!%p194_p3)   ;;  %v1750_v2 = vld [vmem:[%s2181_s1 + $0x48] sm:$0xff] (!%p194_p3)   ;;  %s1555_s5 = sshll.u32 (!%p194_p3), %s1794_s15, 5  ;;  %vm356_vm3 = vcmask (!%p194_p3), 261120  }
   0x9   : > { %s2198_s21 = smov (%p28_p4, %s2196_s21), 0  ;;  %197 = sbr.rel (%p194_p3) target bundleno = 322 (0x142), region = 36 }
   0xa   : > { %1635 = vmatprep.subr.bf16.mxu0 (!%p194_p3), %v1748_v0  ;;  %1603 = vmatprep.subr.bf16.mxu1 (!%p194_p3), %v1749_v1  ;;  %v1751_v3 = vld [vmem:[%s2181_s1 + $0x18] sm:$0xff] (!%p194_p3)   ;;  %v1888_v4 = vld [vmem:[%s2181_s1 + $0x50] sm:$0xff] (!%p194_p3)   ;;  %v1896_v5 = vld [vmem:[%s2181_s1] sm:$0xff] (!%p194_p3)   ;;  %vm274_vm0 = vsmask.f32 (!%p194_p3), 3328  ;;  %vm493_vm4 = vcmask (!%p194_p3), 1042432  }
   0xb   : > { %1636 = vmatpush3.bf16.msra.mxu0 (!%p194_p3), %v1748_v0  ;;  %1604 = vmatpush3.bf16.msra.mxu1 (!%p194_p3), %v1749_v1  ;;  %vm275_vm1 = vsmask.f32 (!%p194_p3), 7440  ;;  %vm494_vm5 = vcmask (!%p194_p3), 1046532   ;;  %s1424_s26 = sshll.u32 (!%p194_p3), %s1794_s15, 2  ;;  %vm1301_vm7 = vcmask (!%p194_p3), 257024  }
   0xc   : > { %1637 = vmatprep.subr.bf16.mxu0 (!%p194_p3), %v1750_v2  ;;  %1605 = vmatprep.subr.bf16.mxu1 (!%p194_p3), %v1751_v3  ;;  %vm1937_vm2 = vmor (!%p194_p3), %vm274_vm0, %vm275_vm1  ;;  %p240_p6 = scmp.lt.s32.totalorder (!%p194_p3), %s1424_s26, 7 }
   0xd   : > { %vm1998_vm6 = vmor (!%p194_p3), %vm493_vm4, %vm494_vm5 }
   0xf   : > { %1638 = vmatpush3.bf16.msra.mxu0 (!%p194_p3), %v1750_v2  ;;  %1606 = vmatpush3.bf16.msra.mxu1 (!%p194_p3), %v1751_v3 }
  0x10   : > { %s2200_s16 = smov (!%p232_p5, %s1798_s16), 1  ;;  %1643 = vmatprep.subr.bf16.mxu0 %v1888_v4  ;;  %1611 = vmatprep.subr.bf16.mxu1 %v1896_v5  ;;  %s2202_s26 = smov (!%p240_p6, %s1424_s26), 7 }
  0x11   : > { %s1707_s30 = smul.u32 80, %s2200_s16  ;;  %s1425_s27 = sshll.u32 %s2200_s16, 3 }
  0x12   : > { %s243_s28 = sadd.s32 %s1425_s27, %s2202_s26 }
  0x13   : > { %s236_s10 = scalar_lea.vmem %s2180_s0, %s1707_s30  ;;  %s1426_s29 = sshll.u32 %s243_s28, 2 }
  0x14   : > { %s1898_s13 = scalar_lea.vmem %s236_s10, %s1555_s5  ;;  %s245_s6 = scalar_lea.vmem %s2183_s3, %s1426_s29 }
  0x15   : > { %v1901_v6 = vld [vmem:[%s1898_s13] sm:$0xf]  ;;  %v1904_v7 = vld [vmem:[%s1898_s13 + $0x4] sm:$0x1]  ;;  %v1907_v8 = vld [vmem:[%s1898_s13 + $0x8] sm:$0xf]  ;;  %s255_s9 = scalar_lea.vmem %s2184_s4, %s1426_s29 }
  0x16   : > { %v1911_v9 = vld [vmem:[%s1898_s13 + $0xc] sm:$0x1]  ;;  %v278_v10 = vshrl.u32 %v1901_v6, 16  ;;  %v281_v11 = vshll.u32 %v1901_v6, 16  ;;  %v287_v12 = vshll.u32 %v1904_v7, 16  ;;  %v292_v13 = vshrl.u32 %v1907_v8, 16 }
  0x17   : > { %v295_v14 = vshll.u32 %v1907_v8, 16  ;;  %v301_v15 = vshll.u32 %v1911_v9, 16  ;;  %v1921_v16 = vld [vmem:[%s1898_s13 + $0x8] sm:$0xf]  ;;  %v1924_v21 = vld [vmem:[%s1898_s13 + $0xc] sm:$0x1] }
  0x18   : > { %v280_v17 = vrot.slane %v278_v10, 4  ;;  %v283_v18 = vrot.slane %v281_v11, 5  ;;  %v289_v19 = vrot.slane %v287_v12, 5  ;;  %v294_v20 = vrot.slane %v292_v13, 4  ;;  %v1927_v24 = vld [vmem:[%s1898_s13 + $0x10] sm:$0xf] }
  0x19   : > { %v297_v22 = vrot.slane %v295_v14, 5  ;;  %v303_v23 = vrot.slane %v301_v15, 5  ;;  %v1930_v25 = vld [vmem:[%s1898_s13 + $0x14] sm:$0x1]  ;;  %v693_v27 = vshrl.u32 %v1921_v16, 16  ;;  %v696_v28 = vshll.u32 %v1921_v16, 16 }
  0x1a   : > { %v284_v26 = vor.u32 %v283_v18, %v280_v17  ;;  %v702_v29 = vshll.u32 %v1924_v21, 16  ;;  %v707_v32 = vshrl.u32 %v1927_v24, 16  ;;  %v710_v33 = vshll.u32 %v1927_v24, 16  ;;  %v1945_v35 = vld [vmem:[%s1898_s13 + $0x10] sm:$0xf] }
  0x1b   : > { %v298_v31 = vor.u32 %v297_v22, %v294_v20  ;;  %v716_v34 = vshll.u32 %v1930_v25, 16  ;;  %v695_v37 = vrot.slane %v693_v27, 4  ;;  %v698_v38 = vrot.slane %v696_v28, 5  ;;  %v1948_v39 = vld [vmem:[%s1898_s13 + $0x14] sm:$0x1] }
  0x1c   : > { %v285_v36 = vrot.slane %v284_v26, 4  ;;  %v709_v41 = vrot.slane %v707_v32, 4  ;;  %v712_v42 = vrot.slane %v710_v33, 5  ;;  %v1951_v43 = vld [vmem:[%s1898_s13 + $0x18] sm:$0xf]  ;;  %v704_v46 = vrot.slane %v702_v29, 5 }
  0x1d   : > { %v299_v40 = vrot.slane %v298_v31, 4  ;;  %v699_v45 = vor.u32 %v698_v38, %v695_v37  ;;  %v718_v47 = vrot.slane %v716_v34, 5  ;;  %v1958_v50 = vld [vmem:[%s1898_s13 + $0x1c] sm:$0x1]  ;;  %v306_v51 = vshrl.u32 %v1945_v35, 16 }
  0x1e   : > { %v290_v44 = vsel %vm1937_vm2, %v285_v36, %v289_v19  ;;  %v713_v49 = vor.u32 %v712_v42, %v709_v41  ;;  %v309_v52 = vshll.u32 %v1945_v35, 16  ;;  %v1963_v53 = vld [vmem:[%s1898_s13 + $0x18] sm:$0xf]  ;;  %v315_v56 = vshll.u32 %v1948_v39, 16  ;;  %v1968_v58 = vld [vmem:[%s1898_s13 + $0x1c] sm:$0x1] }
  0x1f   : > { %v304_v48 = vsel %vm1937_vm2, %v299_v40, %v303_v23  ;;  %v700_v55 = vrot.slane %v699_v45, 4  ;;  %v320_v57 = vshrl.u32 %v1951_v43, 16  ;;  %v308_v60 = vrot.slane %v306_v51, 4  ;;  %v1972_v63 = vld [vmem:[%s1898_s13 + $0x20] sm:$0xf] }
  0x20   : > { %v1437_v54 = vcombine.low %v290_v44, %v304_v48  ;;  %v714_v59 = vrot.slane %v713_v49, 4  ;;  %v311_v61 = vrot.slane %v309_v52, 5  ;;  %v323_v62 = vshll.u32 %v1951_v43, 16  ;;  %v1979_v3 = vld [vmem:[%s1898_s13 + $0x24] sm:$0x1] }
  0x21   : > { %v705_v0 = vsel %vm1937_vm2, %v700_v55, %v704_v46  ;;  %v322_v1 = vrot.slane %v320_v57, 4  ;;  %v329_v2 = vshll.u32 %v1958_v50, 16  ;;  %v317_v12 = vrot.slane %v315_v56, 5  ;;  %v1559_v40 = vld [vmem:[%s245_s6] sm:$0xff]  }
  0x22   : > { %1607 = vmatprep.mubr.msk.bf16.mxu1 %vm356_vm3, %v1437_v54  ;;  %v719_v10 = vsel %vm1937_vm2, %v714_v59, %v718_v47  ;;  %v312_v11 = vor.u32 %v311_v61, %v308_v60  ;;  %v325_v13 = vrot.slane %v323_v62, 5  ;;  %v721_v17 = vshrl.u32 %v1963_v53, 16  ;;  %v1754_v62 = vld [vmem:[%s2181_s1 + $0x58] sm:$0xff]  }
  0x23   : > { %v1487_v14 = vcombine.low %v705_v0, %v719_v10  ;;  %v331_v15 = vrot.slane %v329_v2, 5  ;;  %v724_v20 = vshll.u32 %v1963_v53, 16  ;;  %v730_v22 = vshll.u32 %v1968_v58, 16  ;;  %v1757_v0 = vld [vmem:[%s2181_s1 + $0x60] sm:$0xff]  }
  0x24   : > { %v313_v18 = vrot.slane %v312_v11, 4  ;;  %v326_v19 = vor.u32 %v325_v13, %v322_v1  ;;  %v723_v23 = vrot.slane %v721_v17, 4  ;;  %v735_v26 = vshrl.u32 %v1972_v63, 16  ;;  %v2048_v11 = vld [vmem:[%s1898_s13 + $0x18] sm:$0xf] }
  0x25   : > { %1639 = vmatprep.mubr.msk.bf16.mxu0 %vm356_vm3, %v1487_v14  ;;  %v738_v27 = vshll.u32 %v1972_v63, 16  ;;  %v744_v28 = vshll.u32 %v1979_v3, 16  ;;  %v836_v29 = vrot.slane %v1924_v21, 5  ;;  %v726_v33 = vrot.slane %v724_v20, 5  ;;  %v1761_v20 = vld [vmem:[%s2181_s1 + $0x28] sm:$0xff]  }
  0x26   : > { %v318_v31 = vsel %vm1937_vm2, %v313_v18, %v317_v12  ;;  %v327_v32 = vrot.slane %v326_v19, 4  ;;  %v840_v34 = vrot.slane %v1930_v25, 5  ;;  %v737_v36 = vrot.slane %v735_v26, 4  ;;  %v1755_v25 = vld [vmem:[%s2181_s1 + $0x8] sm:$0xff]  }
  0x27   : > { %v740_v37 = vrot.slane %v738_v27, 5  ;;  %v1443_v38 = vcombine.low %v1901_v6, %v1907_v8  ;;  %v727_v41 = vor.u32 %v726_v33, %v723_v23  ;;  %v732_v42 = vrot.slane %v730_v22, 5 }
  0x28   : > { %v332_v21 = vsel %vm1937_vm2, %v327_v32, %v331_v15  ;;  %v1493_v44 = vrot.slane %v1921_v16, 9  ;;  %v746_v47 = vrot.slane %v744_v28, 5  ;;  %v1494_v48 = vrot.slane %v1927_v24, 9 }
  0x29   : > { %v1438_v45 = vcombine.low %v318_v31, %v332_v21  ;;  %v741_v46 = vor.u32 %v740_v37, %v737_v36  ;;  %v728_v49 = vrot.slane %v727_v41, 4  ;;  %v498_v52 = vrot.slane %v1904_v7, 5  ;;  %v2069_v31 = vld [vmem:[%s1898_s13 + $0x1c] sm:$0x1]  ;;  %v1760_v37 = vld [vmem:[%s2181_s1 + $0x68] sm:$0xff]  }
  0x2a   : > { %v837_v51 = vsel %vm1998_vm6, %v1493_v44, %v836_v29  ;;  %v502_v54 = vrot.slane %v1911_v9, 5  ;;  %v841_v56 = vsel %vm1998_vm6, %v1494_v48, %v840_v34  ;;  %v1449_v59 = vrot.slane %v1901_v6, 9  ;;  %v2066_v29 = vld [vmem:[%s1898_s13 + $0x14] sm:$0x1]  ;;  %v2094_v44 = vld [vmem:[%s1898_s13 + $0x28] sm:$0xf] }
  0x2b   : > { %1608 = vmatmul.mubr.msk.bf16.vlgmr.msra.gmra.mrb[0].mxu1 %vm356_vm3, %v1438_v45  ;;  %v742_v55 = vrot.slane %v741_v46, 4  ;;  %v733_v57 = vsel %vm1937_vm2, %v728_v49, %v732_v42  ;;  %v1450_v60 = vrot.slane %v1907_v8, 9  ;;  %v1501_v9 = vcombine.low %v837_v51, %v841_v56  ;;  %v1763_v49 = vld [vmem:[%s2181_s1 + $0x70] sm:$0xff]  }
  0x2c   : > { %1612 = vmatpush3.bf16.msra.mxu1 %v1896_v5  ;;  %1615 = vmatprep.mubr.msk.bf16.mxu1 %vm356_vm3, %v1443_v38  ;;  %v1759_v5 = vld [vmem:[%s2181_s1 + $0x20] sm:$0xff]   ;;  %v844_v6 = vrot.slane %v1968_v58, 5  ;;  %v848_v8 = vrot.slane %v1979_v3, 5  ;;  %v1495_v1 = vrot.slane %v1963_v53, 9  ;;  %v1496_v2 = vrot.slane %v1972_v63, 9 }
  0x2d   : > { %v747_v7 = vsel %vm1937_vm2, %v742_v55, %v746_v47  ;;  %1613 = vmatprep.subr.bf16.mxu1 %v1755_v25  ;;  %v499_v10 = vsel %vm1998_vm6, %v1449_v59, %v498_v52  ;;  %v503_v58 = vsel %vm1998_vm6, %v1450_v60, %v502_v54  ;;  %v2045_v3 = vld [vmem:[%s1898_s13 + $0x10] sm:$0xf]  ;;  %v1045_v13 = vshrl.u32 %v2048_v11, 16  ;;  %v1514_v60 = vld [vmem:[%s1898_s13 + $0x24] sm:$0x1] }
  0x2e   : > { %v1488_v61 = vcombine.low %v733_v57, %v747_v7  ;;  %v1034_v12 = vshll.u32 %v2045_v3, 16  ;;  %v1048_v14 = vshll.u32 %v2048_v11, 16  ;;  %v1444_v15 = vcombine.low %v1945_v35, %v1951_v43  ;;  %v1767_v57 = vld [vmem:[%s2181_s1 + $0x38] sm:$0xff]  }
  0x2f   : > { %v1457_v17 = vcombine.low %v499_v10, %v503_v58  ;;  %v845_v18 = vsel %vm1998_vm6, %v1495_v1, %v844_v6  ;;  %v849_v19 = vsel %vm1998_vm6, %v1496_v2, %v848_v8  ;;  %v1047_v26 = vrot.slane %v1045_v13, 4  ;;  %v1516_v8 = vld [vmem:[%s1898_s13 + $0x2c] sm:$0x1]  ;;  %v1766_v58 = vld [vmem:[%s2181_s1 + $0x78] sm:$0xff]  }
  0x30   : > { %1640 = vmatmul.mubr.msk.bf16.vlgmr.msra.gmra.mrb[0].mxu0 %vm356_vm3, %v1488_v61  ;;  %1614 = vmatpush3.bf16.msra.mxu1 %v1755_v25  ;;  %v1036_v23 = vrot.slane %v1034_v12, 5  ;;  %v1050_v27 = vrot.slane %v1048_v14, 5  ;;  %v506_v28 = vrot.slane %v1948_v39, 5  ;;  %v510_v32 = vrot.slane %v1958_v50, 5  ;;  %v1765_v50 = vld [vmem:[%s2181_s1 + $0x30] sm:$0xff]  }
  0x31   : > { %1644 = vmatpush3.bf16.msra.mxu0 %v1888_v4  ;;  %1647 = vmatprep.mubr.msk.bf16.mxu0 %vm356_vm3, %v1501_v9  ;;  %v1031_v4 = vshrl.u32 %v2045_v3, 16  ;;  %v1502_v33 = vcombine.low %v845_v18, %v849_v19  ;;  %v1451_v34 = vrot.slane %v1945_v35, 9  ;;  %v1452_v36 = vrot.slane %v1951_v43, 9  ;;  %v2091_v25 = vld [vmem:[%s1898_s13 + $0x20] sm:$0xf] }
  0x32   : > { %1645 = vmatprep.subr.bf16.mxu0 %v1754_v62  ;;  %1619 = vmatprep.subr.bf16.mxu1 %v1759_v5  ;;  %v1521_v39 = vcombine.low %v2045_v3, %v2048_v11  ;;  %v1040_v21 = vshll.u32 %v2066_v29, 16  ;;  %v1051_v41 = vor.u32 %v1050_v27, %v1047_v26  ;;  %v1054_v35 = vshll.u32 %v2069_v31, 16 }
  0x33   : > { %v1033_v22 = vrot.slane %v1031_v4, 4  ;;  %v507_v43 = vsel %vm1998_vm6, %v1451_v34, %v506_v28  ;;  %v511_v42 = vsel %vm1998_vm6, %v1452_v36, %v510_v32  ;;  %v1059_v45 = vshrl.u32 %v2091_v25, 16 }
  0x34   : > { %v1062_v46 = vshll.u32 %v2091_v25, 16  ;;  %v1073_v47 = vshrl.u32 %v2094_v44, 16  ;;  %v1076_v48 = vshll.u32 %v2094_v44, 16  ;;  %v1042_v52 = vrot.slane %v1040_v21, 5 }
  0x35   : > { %1646 = vmatpush3.bf16.msra.mxu0 %v1754_v62  ;;  %v1037_v38 = vor.u32 %v1036_v23, %v1033_v22  ;;  %v1052_v54 = vrot.slane %v1051_v41, 4  ;;  %v1056_v55 = vrot.slane %v1054_v35, 5  ;;  %v1458_v56 = vcombine.low %v507_v43, %v511_v42  ;;  %v1551_v41 = vld [vmem:[%s2182_s2] ss:$0 sm:$0xff] }
  0x36   : > { %1651 = vmatprep.subr.bf16.mxu0 %v1757_v0  ;;  %v1477_v59 = vcombine.low %v1921_v16, %v1927_v24  ;;  %v1061_v7 = vrot.slane %v1059_v45, 4  ;;  %v1064_v9 = vrot.slane %v1062_v46, 5  ;;  %v1075_v61 = vrot.slane %v1073_v47, 4 }
  0x37   : > { %1616 = vmatmul.mubr.msk.bf16.vlgmr.msra.gmra.mrb[0].mxu1 %vm356_vm3, %v1444_v15  ;;  %v1038_v51 = vrot.slane %v1037_v38, 4  ;;  %v1078_v62 = vrot.slane %v1076_v48, 5  ;;  %v1057_v6 = vsel %vm1937_vm2, %v1052_v54, %v1056_v55  ;;  %v1068_v16 = vshll.u32 %v1514_v60, 16  ;;  %v1769_v15 = vld [vmem:[%s2181_s1 + $0x80] sm:$0xff]   ;;  %v1566_v38 = vld [vmem:[%s245_s6 + $0x8] sm:$0xff]  }
  0x38   : > { %1620 = vmatpush3.bf16.msra.mxu1 %v1759_v5  ;;  %1623 = vmatprep.mubr.msk.bf16.mxu1 %vm356_vm3, %v1457_v17  ;;  %v1065_v1 = vor.u32 %v1064_v9, %v1061_v7  ;;  %v1082_v10 = vshll.u32 %v1516_v8, 16  ;;  %v1537_v17 = vrot.slane %v2045_v3, 9  ;;  %v1174_v18 = vrot.slane %v2066_v29, 5 }
  0x39   : > { %1621 = vmatprep.subr.bf16.mxu1 %v1761_v20  ;;  %v1043_v5 = vsel %vm1937_vm2, %v1038_v51, %v1042_v52  ;;  %v1079_v2 = vor.u32 %v1078_v62, %v1075_v61  ;;  %v1070_v12 = vrot.slane %v1068_v16, 5  ;;  %v1538_v19 = vrot.slane %v2048_v11, 9 }
  0x3a   : > { %v1531_v24 = vcombine.low %v1043_v5, %v1057_v6  ;;  %v1066_v4 = vrot.slane %v1065_v1, 4  ;;  %v1084_v14 = vrot.slane %v1082_v10, 5  ;;  %v1478_v22 = vcombine.low %v1963_v53, %v1972_v63  ;;  %v1771_v53 = vld [vmem:[%s2181_s1 + $0x88] sm:$0xff]  }
  0x3b   : > { %v1080_v13 = vrot.slane %v1079_v2, 4  ;;  %v1175_v3 = vsel %vm1998_vm6, %v1537_v17, %v1174_v18  ;;  %v1539_v30 = vrot.slane %v2091_v25, 9  ;;  %v1182_v63 = vrot.slane %v1514_v60, 5 }
  0x3c   : > { %1648 = vmatmul.mubr.msk.bf16.vlgmr.msra.gmra.mrb[0].mxu0 %vm356_vm3, %v1502_v33  ;;  %1622 = vmatpush3.bf16.msra.mxu1 %v1761_v20  ;;  %v1178_v20 = vrot.slane %v2069_v31, 5  ;;  %v1071_v23 = vsel %vm1937_vm2, %v1066_v4, %v1070_v12  ;;  %v1540_v29 = vrot.slane %v2094_v44, 9  ;;  %v1186_v31 = vrot.slane %v1516_v8, 5 }
  0x3d   : > { %1652 = vmatpush3.bf16.msra.mxu0 %v1757_v0  ;;  %1655 = vmatprep.mubr.msk.bf16.mxu0 %vm356_vm3, %v1521_v39  ;;  %v1522_v0 = vcombine.low %v2091_v25, %v2094_v44  ;;  %v1085_v26 = vsel %vm1937_vm2, %v1080_v13, %v1084_v14  ;;  %v1183_v32 = vsel %vm1998_vm6, %v1539_v30, %v1182_v63  ;;  %v1564_v43 = vunpack.c.l.bf16 %v1566_v38 }
  0x3e   : > { %1653 = vmatprep.subr.bf16.mxu0 %v1760_v37  ;;  %1627 = vmatprep.subr.bf16.mxu1 %v1765_v50  ;;  %v1179_v27 = vsel %vm1998_vm6, %v1538_v19, %v1178_v20  ;;  %v1532_v11 = vcombine.low %v1071_v23, %v1085_v26  ;;  %v1187_v33 = vsel %vm1998_vm6, %v1540_v29, %v1186_v31  ;;  %v1560_v44 = vunpack.c.l.bf16 %v1559_v40 }
  0x3f   : > { %v1545_v28 = vcombine.low %v1175_v3, %v1179_v27  ;;  %v1546_v34 = vcombine.low %v1183_v32, %v1187_v33  ;;  %v1565_v48 = vunpack.c.h.bf16 %v1566_v38  ;;  %v1561_v54 = vunpack.c.h.bf16 %v1559_v40 }
  0x41   : > { %1654 = vmatpush3.bf16.msra.mxu0 %v1760_v37 }
  0x42   : > { %1659 = vmatprep.subr.bf16.mxu0 %v1763_v49 }
  0x43   : > { %1624 = vmatmul.mubr.msk.bf16.vlgmr.msra.gmra.mrb[0].mxu1 %vm356_vm3, %v1458_v56 }
  0x44   : > { %1628 = vmatpush3.bf16.msra.mxu1 %v1765_v50  ;;  %1631 = vmatprep.mubr.msk.bf16.mxu1 %vm356_vm3, %v1477_v59 }
  0x45   : > { %1629 = vmatprep.subr.bf16.mxu1 %v1767_v57 }
  0x48   : > { %1656 = vmatmul.mubr.msk.bf16.vlgmr.msra.gmra.mrb[0].mxu0 %vm356_vm3, %v1522_v0  ;;  %1630 = vmatpush3.bf16.msra.mxu1 %v1767_v57 }
  0x49   : > { %1660 = vmatpush3.bf16.msra.mxu0 %v1763_v49  ;;  %1663 = vmatprep.mubr.msk.bf16.mxu0 %vm356_vm3, %v1531_v24 }
  0x4a   : > { %1661 = vmatprep.subr.bf16.mxu0 %v1766_v58 }
  0x4d   : > { %1662 = vmatpush3.bf16.msra.mxu0 %v1766_v58 }
  0x4e   : > { %1667 = vmatprep.subr.bf16.mxu0 %v1769_v15 }
  0x4f   : > { %1632 = vmatmul.mubr.msk.bf16.vlgmr.msra.gmra.mrb[0].mxu1 %vm356_vm3, %v1478_v22 }
  0x54   : > { %1664 = vmatmul.mubr.msk.bf16.vlgmr.msra.gmra.mrb[0].mxu0 %vm356_vm3, %v1532_v11 }
  0x55   : > { %1668 = vmatpush3.bf16.msra.mxu0 %v1769_v15  ;;  %1671 = vmatprep.mubr.msk.bf16.mxu0 %vm356_vm3, %v1545_v28 }
  0x56   : > { %1669 = vmatprep.subr.bf16.mxu0 %v1771_v53 }
  0x59   : > { %1670 = vmatpush3.bf16.msra.mxu0 %v1771_v53 }
  0x60   : > { %1672 = vmatmul.mubr.msk.bf16.vlgmr.msra.gmra.mrb[0].mxu0 %vm356_vm3, %v1546_v34 }
 0x122   : > { %v1633_v36 = vpop.f32.mrb[0].mxu1 }
 0x123   : > { %v673_v39 = vpop.f32.mrb[1].mxu1 }
 0x124   : > { %v1634_v37 = vpop.f32.mrb[2].mxu1 }
 0x125   : > { %v676_v50 = vpop.f32.mrb[3].mxu1 }
 0x133   : > { %v1673_v21 = vpop.f32.mrb[0].mxu0 }
 0x134   : > { %v1675_v35 = vadd.f32 %v1673_v21, %v1633_v36  ;;  %v1251_v42 = vpop.f32.mrb[1].mxu0 }
 0x135   : > { %v1676_v25 = vadd.f32 %v1251_v42, %v673_v39  ;;  %v1674_v45 = vpop.f32.mrb[2].mxu0 }
 0x136   : > { %v1279_v46 = vadd.f32 %v1675_v35, %v1551_v41  ;;  %v1677_v47 = vadd.f32 %v1674_v45, %v1634_v37  ;;  %v1254_v49 = vpop.f32.mrb[3].mxu0 }
 0x137   : > { %v1277_v51 = vadd.f32 %v1676_v25, %v1551_v41  ;;  %v1678_v52 = vadd.f32 %v1254_v49, %v676_v50 }
 0x138   : > { %v1291_v55 = vadd.f32 %v1564_v43, %v1279_v46  ;;  %v1280_v56 = vadd.f32 %v1677_v47, %v1551_v41 }
 0x139   : > { %v1289_v57 = vadd.f32 %v1560_v44, %v1277_v51  ;;  %v1278_v59 = vadd.f32 %v1678_v52, %v1551_v41 }
 0x13a   : > { %v1295_v60 = vmax.f32 %v1291_v55, 0.0  ;;  %v1292_v7 = vadd.f32 %v1565_v48, %v1280_v56 }
 0x13b   : > { %v1293_v9 = vmax.f32 %v1289_v57, 0.0  ;;  %v1290_v61 = vadd.f32 %v1561_v54, %v1278_v59 }
 0x13c   : > { %v1299_v62 = vpack.c.bf16 %v1295_v60, %v1295_v60  ;;  %v1296_v5 = vmax.f32 %v1292_v7, 0.0 }
 0x13d   : > { %v1297_v6 = vpack.c.bf16 %v1293_v9, %v1293_v9  ;;  %v1294_v8 = vmax.f32 %v1290_v61, 0.0 }
 0x13e   : > { %1304 = vst.msk [vmem:[%s255_s9 + $0x8] sm:$0xf] %vm1301_vm7, %v1299_v62  ;;  %v1300_v0 = vpack.c.bf16 %v1296_v5, %v1296_v5 }
 0x13f   : > { %1302 = vst.msk [vmem:[%s255_s9] sm:$0xf] %vm1301_vm7, %v1297_v6  ;;  %v1298_v16 = vpack.c.bf16 %v1294_v8, %v1294_v8 }
 0x140   : > { %1305 = vst.msk [vmem:[%s255_s9 + $0xc] sm:$0xf] %vm1301_vm7, %v1300_v0 }
 0x141   : > { %1303 = vst.msk [vmem:[%s255_s9 + $0x4] sm:$0xf] %vm1301_vm7, %v1298_v16 }
 0x142 PF: > { %s14_s19 = sadd.s32 1, %s1810_s19   ;;  %s2189_s15 = smov %s1802_s17 }
 0x143   : > { %p11_p7 = scmp.ge.s32.totalorder %s14_s19, 6   ;;  %s2190_s16 = smov %s1806_s18 }
 0x144   : > { %s2191_s17 = smov %s2194_s20  ;;  %s2192_s18 = smov %s2198_s21 }
 0x145   :  { %13 = sbr.rel (!%p11_p7) target bundleno = 3 (0x3), region = 80 }

// kernel: linknet_encoder_forward.7
= control target key start
LH: loop header
LB: loop body
LE: loop exit
PB: predicated region body
PF: predicated region fallthrough
CT: control target
= control target key end

     0   :  { %9 = vsyncpa [#allocation3], 0  ;;  %s2359_s0 = inlined_call_operand.vmem [shape: bf16[2,10,10,32], index: 0, kind: input, shape index: {}]   ;;  %s2360_s1 = inlined_call_operand.vmem [shape: bf16[9,32,32], index: 1, kind: input, shape index: {}]   ;;  %s2361_s2 = inlined_call_operand.vmem [shape: f32[1,32], index: 2, kind: input, shape index: {}]   ;;  %s2362_s3 = inlined_call_operand.vmem [shape: bf16[2,8,8,32], index: 3, kind: input, shape index: {}]   ;;  %s2363_s4 = inlined_call_operand.hbm [shape: f32[2,8,8,32], index: 4, kind: output, shape index: {}]  }
   0x1   :  { %11 = vsyncpa [#allocation3 + $0x1], 0  ;;  %s1924_s15 = smov 0   ;;  %s1926_s16 = smov 0  }
   0x2   :  { %s1928_s17 = smov 0   ;;  %s1930_s18 = smov 0  }
   0x3   :  { %s1932_s19 = smov 0   ;;  %s1934_s20 = smov 0  }
   0x4   :  { %s1936_s21 = smov 0   ;;  %s1938_s22 = smov 0  }
   0x5 LB: > { %s1411_s23 = sadd.s32 4294967295, %s1894_s22   ;;  %s1412_s24 = sadd.s32 4294967294, %s1894_s22   ;;  %s1894_s22 = sphi %s1938_s22, %s17_s22   ;;  %s1890_s21 = sphi %s1936_s21, %s2376_s21   ;;  %s1886_s20 = sphi %s1934_s20, %s2375_s20   ;;  %s1882_s19 = sphi %s1932_s19, %s2374_s19   ;;  %s1878_s18 = sphi %s1930_s18, %s2373_s18   ;;  %s1874_s17 = sphi %s1928_s17, %s2372_s17   ;;  %s1870_s16 = sphi %s1926_s16, %s2371_s16   ;;  %s1866_s15 = sphi %s1924_s15, %s2370_s15  }
   0x6   : > { %s26_s25 = sadd.s32 1, %s1886_s20  ;;  %s29_s26 = sadd.s32 1, %s1890_s21 }
   0x7   : > { %p27_p0 = scmp.ge.s32.totalorder %s26_s25, 2  ;;  %p144_p1 = scmp.ne.s32.totalorder %s1874_s17, %s1870_s16 }
   0x8   : > { %p145_p2 = scmp.eq.s32.totalorder %s1411_s23, 3  ;;  %p150_p5 = scmp.ne.s32.totalorder %s1870_s16, %s1866_s15 }
   0x9   : > { %s2378_s25 = smov (%p27_p0, %s26_s25), 0  ;;  %s2380_s26 = smov (!%p27_p0, %s29_s26), %s1890_s21 }
   0xa   : > { %s130_s27 = ssub.s32 %s1886_s20, %s2378_s25  ;;  %p1975_p3 = por %p145_p2, %p144_p1 }
   0xb   : > { %p31_p4 = scmp.ge.s32.totalorder %s2380_s26, 2  ;;  %p151_p6 = scmp.eq.s32.totalorder %s1412_s24, 3 }
   0xc   : > { %p1415_p7 = scmp.ge.s32.totalorder %s1894_s22, 1  ;;  %p196_p9 = scmp.lt.s32.totalorder %s1894_s22, 5 }
   0xd   : > { %s2382_s26 = smov (%p31_p4, %s2380_s26), 0  ;;  %p1984_p8 = por %p151_p6, %p150_p5 }
   0xe   : > { %s129_s30 = ssub.s32 %s1890_s21, %s2382_s26  ;;  %s134_s5 = sadd.s32 1, %s1874_s17 }
   0xf   : > { %s131_s6 = sor.u32 %s130_s27, %s129_s30  ;;  %p197_p10 = pnand %p1415_p7, %p196_p9 }
  0x10   : > { %p132_p11 = scmp.eq.s32.totalorder %s131_s6, 0  ;;  %v1776_v0 = vld [vmem:[%s2360_s1 + $0x40] sm:$0xff] (!%p197_p10)   ;;  %p231_p12 = scmp.lt.s32.totalorder (!%p197_p10), %s1882_s19, 1  ;;  %v1777_v1 = vld [vmem:[%s2360_s1 + $0x10] sm:$0xff] (!%p197_p10)   ;;  %v1778_v2 = vld [vmem:[%s2360_s1 + $0x48] sm:$0xff] (!%p197_p10)   ;;  %vm346_vm3 = vcmask (!%p197_p10), 261120  }
  0x11   : > { %200 = sbr.rel (%p197_p10) target bundleno = 343 (0x157), region = 36  ;;  %1630 = vmatprep.subr.bf16.mxu0 (!%p197_p10), %v1776_v0  ;;  %1598 = vmatprep.subr.bf16.mxu1 (!%p197_p10), %v1777_v1  ;;  %v1779_v3 = vld [vmem:[%s2360_s1 + $0x18] sm:$0xff] (!%p197_p10)   ;;  %s1550_s30 = sshll.u32 (!%p197_p10), %s1878_s18, 5  ;;  %v2016_v4 = vld [vmem:[%s2360_s1 + $0x50] sm:$0xff] (!%p197_p10)   ;;  %v2024_v5 = vld [vmem:[%s2360_s1] sm:$0xff] (!%p197_p10)   ;;  %vm483_vm4 = vcmask (!%p197_p10), 1042432  }
  0x12   : > { %s1993_s7 = scalar_select %p132_p11, %s1874_s17, %s134_s5  }
  0x13   : > { %1631 = vmatpush3.bf16.msra.mxu0 (!%p197_p10), %v1776_v0  ;;  %1599 = vmatpush3.bf16.msra.mxu1 (!%p197_p10), %v1777_v1  ;;  %vm264_vm0 = vsmask.f32 (!%p197_p10), 3328  ;;  %vm265_vm1 = vsmask.f32 (!%p197_p10), 7440  ;;  %vm484_vm5 = vcmask (!%p197_p10), 1046532   ;;  %s1418_s24 = sshll.u32 (!%p197_p10), %s1878_s18, 2 }
  0x14   : > { %1632 = vmatprep.subr.bf16.mxu0 (!%p197_p10), %v1778_v2  ;;  %1600 = vmatprep.subr.bf16.mxu1 (!%p197_p10), %v1779_v3  ;;  %vm2065_vm2 = vmor (!%p197_p10), %vm264_vm0, %vm265_vm1  ;;  %p239_p13 = scmp.lt.s32.totalorder (!%p197_p10), %s1418_s24, 7  ;;  %s1545_s18 = sshll.u32 (!%p197_p10), %s1882_s19, 3 }
  0x15   : > { %vm2126_vm6 = vmor (!%p197_p10), %vm483_vm4, %vm484_vm5 }
  0x17   : > { %1633 = vmatpush3.bf16.msra.mxu0 (!%p197_p10), %v1778_v2  ;;  %1601 = vmatpush3.bf16.msra.mxu1 (!%p197_p10), %v1779_v3 }
  0x18   : > { %s2006_s14 = scalar_select %p231_p12, %s1882_s19, 1  ;;  %1638 = vmatprep.subr.bf16.mxu0 %v2016_v4  ;;  %1606 = vmatprep.subr.bf16.mxu1 %v2024_v5 }
  0x1a   : > { %s1702_s27 = smul.u32 80, %s2006_s14 }
  0x1c   : > { %s235_s10 = scalar_lea.vmem %s2359_s0, %s1702_s27 }
  0x1d   : > { %s2026_s13 = scalar_lea.vmem %s235_s10, %s1550_s30  ;;  %s1419_s30 = sshll.u32 %s2006_s14, 3 }
  0x1e   : > { %v2029_v6 = vld [vmem:[%s2026_s13] sm:$0xf]  ;;  %v2032_v7 = vld [vmem:[%s2026_s13 + $0x4] sm:$0x1]  ;;  %v2035_v8 = vld [vmem:[%s2026_s13 + $0x8] sm:$0xf]  ;;  %s1304_s14 = sadd.s32 %s1545_s18, %s1418_s24 }
  0x1f   : > { %v2039_v9 = vld [vmem:[%s2026_s13 + $0xc] sm:$0x1]  ;;  %v268_v10 = vshrl.u32 %v2029_v6, 16  ;;  %v271_v11 = vshll.u32 %v2029_v6, 16  ;;  %v277_v12 = vshll.u32 %v2032_v7, 16  ;;  %v282_v13 = vshrl.u32 %v2035_v8, 16 }
  0x20   : > { %v285_v14 = vshll.u32 %v2035_v8, 16  ;;  %v291_v15 = vshll.u32 %v2039_v9, 16  ;;  %v2049_v16 = vld [vmem:[%s2026_s13 + $0x8] sm:$0xf]  ;;  %v2052_v21 = vld [vmem:[%s2026_s13 + $0xc] sm:$0x1] }
  0x21   : > { %v270_v17 = vrot.slane %v268_v10, 4  ;;  %v273_v18 = vrot.slane %v271_v11, 5  ;;  %v279_v19 = vrot.slane %v277_v12, 5  ;;  %v284_v20 = vrot.slane %v282_v13, 4  ;;  %v2055_v24 = vld [vmem:[%s2026_s13 + $0x10] sm:$0xf] }
  0x22   : > { %v287_v22 = vrot.slane %v285_v14, 5  ;;  %v293_v23 = vrot.slane %v291_v15, 5  ;;  %v2058_v25 = vld [vmem:[%s2026_s13 + $0x14] sm:$0x1]  ;;  %v683_v27 = vshrl.u32 %v2049_v16, 16  ;;  %v686_v28 = vshll.u32 %v2049_v16, 16 }
  0x23   : > { %v274_v26 = vor.u32 %v273_v18, %v270_v17  ;;  %v692_v29 = vshll.u32 %v2052_v21, 16  ;;  %v697_v32 = vshrl.u32 %v2055_v24, 16  ;;  %v700_v33 = vshll.u32 %v2055_v24, 16  ;;  %v2073_v35 = vld [vmem:[%s2026_s13 + $0x10] sm:$0xf]  ;;  %s240_s27 = scalar_select %p239_p13, %s1418_s24, 7 }
  0x24   : > { %v288_v31 = vor.u32 %v287_v22, %v284_v20  ;;  %v706_v34 = vshll.u32 %v2058_v25, 16  ;;  %v685_v37 = vrot.slane %v683_v27, 4  ;;  %v688_v38 = vrot.slane %v686_v28, 5  ;;  %v2076_v39 = vld [vmem:[%s2026_s13 + $0x14] sm:$0x1] }
  0x25   : > { %v275_v36 = vrot.slane %v274_v26, 4  ;;  %v699_v41 = vrot.slane %v697_v32, 4  ;;  %v702_v42 = vrot.slane %v700_v33, 5  ;;  %v2079_v43 = vld [vmem:[%s2026_s13 + $0x18] sm:$0xf]  ;;  %v694_v46 = vrot.slane %v692_v29, 5  ;;  %s242_s5 = sadd.s32 %s1419_s30, %s240_s27 }
  0x26   : > { %v289_v40 = vrot.slane %v288_v31, 4  ;;  %v689_v45 = vor.u32 %v688_v38, %v685_v37  ;;  %v708_v47 = vrot.slane %v706_v34, 5  ;;  %v2086_v50 = vld [vmem:[%s2026_s13 + $0x1c] sm:$0x1]  ;;  %v296_v51 = vshrl.u32 %v2073_v35, 16  ;;  %s1420_s6 = sshll.u32 %s242_s5, 2 }
  0x27   : > { %v280_v44 = vsel %vm2065_vm2, %v275_v36, %v279_v19  ;;  %v703_v49 = vor.u32 %v702_v42, %v699_v41  ;;  %v299_v52 = vshll.u32 %v2073_v35, 16  ;;  %v2091_v53 = vld [vmem:[%s2026_s13 + $0x18] sm:$0xf]  ;;  %v305_v56 = vshll.u32 %v2076_v39, 16  ;;  %v2096_v58 = vld [vmem:[%s2026_s13 + $0x1c] sm:$0x1]  ;;  %s244_s10 = scalar_lea.vmem %s2362_s3, %s1420_s6 }
  0x28   : > { %v294_v48 = vsel %vm2065_vm2, %v289_v40, %v293_v23  ;;  %v690_v55 = vrot.slane %v689_v45, 4  ;;  %v310_v57 = vshrl.u32 %v2079_v43, 16  ;;  %v298_v60 = vrot.slane %v296_v51, 4  ;;  %v2100_v63 = vld [vmem:[%s2026_s13 + $0x20] sm:$0xf]  ;;  %s1546_s27 = sshll.u32 %s1304_s14, 7 }
  0x29   : > { %v1428_v54 = vcombine.low %v280_v44, %v294_v48  ;;  %v704_v59 = vrot.slane %v703_v49, 4  ;;  %v301_v61 = vrot.slane %v299_v52, 5  ;;  %v313_v62 = vshll.u32 %v2079_v43, 16  ;;  %v2107_v3 = vld [vmem:[%s2026_s13 + $0x24] sm:$0x1]  ;;  %s2298_s6 = scalar_lea.hbm %s2363_s4, %s1546_s27 }
  0x2a   : > { %v695_v0 = vsel %vm2065_vm2, %v690_v55, %v694_v46  ;;  %v312_v1 = vrot.slane %v310_v57, 4  ;;  %v319_v2 = vshll.u32 %v2086_v50, 16  ;;  %v307_v12 = vrot.slane %v305_v56, 5 }
  0x2b   : > { %1602 = vmatprep.mubr.msk.bf16.mxu1 %vm346_vm3, %v1428_v54  ;;  %v709_v10 = vsel %vm2065_vm2, %v704_v59, %v708_v47  ;;  %v302_v11 = vor.u32 %v301_v61, %v298_v60  ;;  %v315_v13 = vrot.slane %v313_v62, 5  ;;  %v711_v17 = vshrl.u32 %v2091_v53, 16  ;;  %v1782_v62 = vld [vmem:[%s2360_s1 + $0x58] sm:$0xff]  }
  0x2c   : > { %v1478_v14 = vcombine.low %v695_v0, %v709_v10  ;;  %v321_v15 = vrot.slane %v319_v2, 5  ;;  %v714_v20 = vshll.u32 %v2091_v53, 16  ;;  %v720_v22 = vshll.u32 %v2096_v58, 16  ;;  %v1785_v0 = vld [vmem:[%s2360_s1 + $0x60] sm:$0xff]  }
  0x2d   : > { %v303_v18 = vrot.slane %v302_v11, 4  ;;  %v316_v19 = vor.u32 %v315_v13, %v312_v1  ;;  %v713_v23 = vrot.slane %v711_v17, 4  ;;  %v725_v26 = vshrl.u32 %v2100_v63, 16  ;;  %v2176_v11 = vld [vmem:[%s2026_s13 + $0x18] sm:$0xf] }
  0x2e   : > { %1634 = vmatprep.mubr.msk.bf16.mxu0 %vm346_vm3, %v1478_v14  ;;  %v728_v27 = vshll.u32 %v2100_v63, 16  ;;  %v734_v28 = vshll.u32 %v2107_v3, 16  ;;  %v826_v29 = vrot.slane %v2052_v21, 5  ;;  %v716_v33 = vrot.slane %v714_v20, 5  ;;  %v1789_v20 = vld [vmem:[%s2360_s1 + $0x28] sm:$0xff]  }
  0x2f   : > { %v308_v31 = vsel %vm2065_vm2, %v303_v18, %v307_v12  ;;  %v317_v32 = vrot.slane %v316_v19, 4  ;;  %v830_v34 = vrot.slane %v2058_v25, 5  ;;  %v727_v36 = vrot.slane %v725_v26, 4  ;;  %v1783_v25 = vld [vmem:[%s2360_s1 + $0x8] sm:$0xff]  }
  0x30   : > { %v730_v37 = vrot.slane %v728_v27, 5  ;;  %v1434_v38 = vcombine.low %v2029_v6, %v2035_v8  ;;  %v717_v41 = vor.u32 %v716_v33, %v713_v23  ;;  %v722_v42 = vrot.slane %v720_v22, 5 }
  0x31   : > { %v322_v21 = vsel %vm2065_vm2, %v317_v32, %v321_v15  ;;  %v1484_v44 = vrot.slane %v2049_v16, 9  ;;  %v736_v47 = vrot.slane %v734_v28, 5  ;;  %v1485_v48 = vrot.slane %v2055_v24, 9 }
  0x32   : > { %v1429_v45 = vcombine.low %v308_v31, %v322_v21  ;;  %v731_v46 = vor.u32 %v730_v37, %v727_v36  ;;  %v718_v49 = vrot.slane %v717_v41, 4  ;;  %v488_v52 = vrot.slane %v2032_v7, 5  ;;  %v2197_v31 = vld [vmem:[%s2026_s13 + $0x1c] sm:$0x1]  ;;  %v1788_v37 = vld [vmem:[%s2360_s1 + $0x68] sm:$0xff]  }
  0x33   : > { %v827_v51 = vsel %vm2126_vm6, %v1484_v44, %v826_v29  ;;  %v492_v54 = vrot.slane %v2039_v9, 5  ;;  %v831_v56 = vsel %vm2126_vm6, %v1485_v48, %v830_v34  ;;  %v1440_v59 = vrot.slane %v2029_v6, 9  ;;  %v2194_v29 = vld [vmem:[%s2026_s13 + $0x14] sm:$0x1]  ;;  %v2222_v44 = vld [vmem:[%s2026_s13 + $0x28] sm:$0xf] }
  0x34   : > { %1603 = vmatmul.mubr.msk.bf16.vlgmr.msra.gmra.mrb[0].mxu1 %vm346_vm3, %v1429_v45  ;;  %v732_v55 = vrot.slane %v731_v46, 4  ;;  %v723_v57 = vsel %vm2065_vm2, %v718_v49, %v722_v42  ;;  %v1441_v60 = vrot.slane %v2035_v8, 9  ;;  %v1492_v9 = vcombine.low %v827_v51, %v831_v56  ;;  %v1791_v49 = vld [vmem:[%s2360_s1 + $0x70] sm:$0xff]  }
  0x35   : > { %1607 = vmatpush3.bf16.msra.mxu1 %v2024_v5  ;;  %1610 = vmatprep.mubr.msk.bf16.mxu1 %vm346_vm3, %v1434_v38  ;;  %v1787_v5 = vld [vmem:[%s2360_s1 + $0x20] sm:$0xff]   ;;  %v834_v6 = vrot.slane %v2096_v58, 5  ;;  %v838_v8 = vrot.slane %v2107_v3, 5  ;;  %v1486_v1 = vrot.slane %v2091_v53, 9  ;;  %v1487_v2 = vrot.slane %v2100_v63, 9 }
  0x36   : > { %v737_v7 = vsel %vm2065_vm2, %v732_v55, %v736_v47  ;;  %1608 = vmatprep.subr.bf16.mxu1 %v1783_v25  ;;  %v489_v10 = vsel %vm2126_vm6, %v1440_v59, %v488_v52  ;;  %v493_v58 = vsel %vm2126_vm6, %v1441_v60, %v492_v54  ;;  %v2173_v3 = vld [vmem:[%s2026_s13 + $0x10] sm:$0xf]  ;;  %v1035_v13 = vshrl.u32 %v2176_v11, 16  ;;  %v1505_v60 = vld [vmem:[%s2026_s13 + $0x24] sm:$0x1] }
  0x37   : > { %v1479_v61 = vcombine.low %v723_v57, %v737_v7  ;;  %v1024_v12 = vshll.u32 %v2173_v3, 16  ;;  %v1038_v14 = vshll.u32 %v2176_v11, 16  ;;  %v1435_v15 = vcombine.low %v2073_v35, %v2079_v43  ;;  %v1795_v57 = vld [vmem:[%s2360_s1 + $0x38] sm:$0xff]  }
  0x38   : > { %v1448_v17 = vcombine.low %v489_v10, %v493_v58  ;;  %v835_v18 = vsel %vm2126_vm6, %v1486_v1, %v834_v6  ;;  %v839_v19 = vsel %vm2126_vm6, %v1487_v2, %v838_v8  ;;  %v1037_v26 = vrot.slane %v1035_v13, 4  ;;  %v1507_v8 = vld [vmem:[%s2026_s13 + $0x2c] sm:$0x1]  ;;  %v1794_v58 = vld [vmem:[%s2360_s1 + $0x78] sm:$0xff]  }
  0x39   : > { %1635 = vmatmul.mubr.msk.bf16.vlgmr.msra.gmra.mrb[0].mxu0 %vm346_vm3, %v1479_v61  ;;  %1609 = vmatpush3.bf16.msra.mxu1 %v1783_v25  ;;  %v1026_v23 = vrot.slane %v1024_v12, 5  ;;  %v1040_v27 = vrot.slane %v1038_v14, 5  ;;  %v496_v28 = vrot.slane %v2076_v39, 5  ;;  %v500_v32 = vrot.slane %v2086_v50, 5  ;;  %v1793_v50 = vld [vmem:[%s2360_s1 + $0x30] sm:$0xff]  }
  0x3a   : > { %1639 = vmatpush3.bf16.msra.mxu0 %v2016_v4  ;;  %1642 = vmatprep.mubr.msk.bf16.mxu0 %vm346_vm3, %v1492_v9  ;;  %v1021_v4 = vshrl.u32 %v2173_v3, 16  ;;  %v1493_v33 = vcombine.low %v835_v18, %v839_v19  ;;  %v1442_v34 = vrot.slane %v2073_v35, 9  ;;  %v1443_v36 = vrot.slane %v2079_v43, 9  ;;  %v2219_v25 = vld [vmem:[%s2026_s13 + $0x20] sm:$0xf]  ;;  %s228_s13 = sand.u32 1, %s1870_s16  }
  0x3b   : > { %1640 = vmatprep.subr.bf16.mxu0 %v1782_v62  ;;  %1614 = vmatprep.subr.bf16.mxu1 %v1787_v5  ;;  %v1512_v39 = vcombine.low %v2173_v3, %v2176_v11  ;;  %v1030_v21 = vshll.u32 %v2194_v29, 16  ;;  %v1041_v41 = vor.u32 %v1040_v27, %v1037_v26  ;;  %v1044_v35 = vshll.u32 %v2197_v31, 16  ;;  %s1416_s23 = sshll.u32 %s228_s13, 5  ;;  %s2307_s8 = scalar_lea.sflag [#allocation3], %s228_s13 }
  0x3c   : > { %v1023_v22 = vrot.slane %v1021_v4, 4  ;;  %v497_v43 = vsel %vm2126_vm6, %v1442_v34, %v496_v28  ;;  %v501_v42 = vsel %vm2126_vm6, %v1443_v36, %v500_v32  ;;  %v1049_v45 = vshrl.u32 %v2219_v25, 16  ;;  %s230_s19 = scalar_lea.vmem [#allocation2], %s1416_s23 }
  0x3d   : > { %v1052_v46 = vshll.u32 %v2219_v25, 16  ;;  %v1063_v47 = vshrl.u32 %v2222_v44, 16  ;;  %v1066_v48 = vshll.u32 %v2222_v44, 16  ;;  %v1032_v52 = vrot.slane %v1030_v21, 5  ;;  %v1561_v21 = vld [vmem:[%s244_s10 + $0x8] sm:$0xff]   ;;  %s1307_s30 = sshll.u32 %s230_s19, 4  ;;  %s2300_s30 = int_to_ptr.vmem [resolvable:$true] %s1307_s30 }
  0x3e   : > { %1641 = vmatpush3.bf16.msra.mxu0 %v1782_v62  ;;  %v1027_v38 = vor.u32 %v1026_v23, %v1023_v22  ;;  %v1042_v54 = vrot.slane %v1041_v41, 4  ;;  %v1046_v55 = vrot.slane %v1044_v35, 5  ;;  %v1449_v56 = vcombine.low %v497_v43, %v501_v42  ;;  %v1554_v43 = vld [vmem:[%s244_s10] sm:$0xff]   ;;  %s1800_s9 = scalar_lea.vmem %s2300_s30, 512  ;;  %s1896_s10 = smov [#allocation2]  }
  0x3f   : > { %1646 = vmatprep.subr.bf16.mxu0 %v1785_v0  ;;  %v1468_v59 = vcombine.low %v2049_v16, %v2055_v24  ;;  %v1051_v7 = vrot.slane %v1049_v45, 4  ;;  %v1054_v9 = vrot.slane %v1052_v46, 5  ;;  %v1065_v61 = vrot.slane %v1063_v47, 4  ;;  %p1801_p0 = scmp.ne.s32.totalorder %s2300_s30, %s1800_s9  ;;  %s1804_s11 = sshll.u32 %s1896_s10, 4  ;;  %s1805_s11 = int_to_ptr.vmem [resolvable:$false] %s1804_s11 }
  0x40   : > { %1611 = vmatmul.mubr.msk.bf16.vlgmr.msra.gmra.mrb[0].mxu1 %vm346_vm3, %v1435_v15  ;;  %v1028_v51 = vrot.slane %v1027_v38, 4  ;;  %v1068_v62 = vrot.slane %v1066_v48, 5  ;;  %v1047_v6 = vsel %vm2065_vm2, %v1042_v54, %v1046_v55  ;;  %v1058_v16 = vshll.u32 %v1505_v60, 16  ;;  %v1797_v15 = vld [vmem:[%s2360_s1 + $0x80] sm:$0xff]   ;;  %s1806_s12 = scalar_lea.vmem %s1805_s11, 1024  ;;  %p1807_p4 = scmp.lt.s32.totalorder %s2300_s30, %s1805_s11 }
  0x41   : > { %1615 = vmatpush3.bf16.msra.mxu1 %v1787_v5  ;;  %1618 = vmatprep.mubr.msk.bf16.mxu1 %vm346_vm3, %v1448_v17  ;;  %v1055_v1 = vor.u32 %v1054_v9, %v1051_v7  ;;  %v1072_v10 = vshll.u32 %v1507_v8, 16  ;;  %v1528_v17 = vrot.slane %v2173_v3, 9  ;;  %v1164_v18 = vrot.slane %v2194_v29, 5  ;;  %v1542_v38 = vld [vmem:[%s2361_s2] ss:$0 sm:$0xff]  ;;  %p1802_p1 = pnand %p1801_p0, %p1975_p3  ;;  %p1808_p5 = scmp.lt.s32.totalorder %s1806_s12, %s1800_s9 }
  0x42   : > { %1616 = vmatprep.subr.bf16.mxu1 %v1789_v20  ;;  %v1033_v5 = vsel %vm2065_vm2, %v1028_v51, %v1032_v52  ;;  %v1069_v2 = vor.u32 %v1068_v62, %v1065_v61  ;;  %v1060_v12 = vrot.slane %v1058_v16, 5  ;;  %v1529_v19 = vrot.slane %v2176_v11, 9 }
  0x43   : > { %v1522_v24 = vcombine.low %v1033_v5, %v1047_v6  ;;  %v1056_v4 = vrot.slane %v1055_v1, 4  ;;  %v1074_v14 = vrot.slane %v1072_v10, 5  ;;  %v1469_v22 = vcombine.low %v2091_v53, %v2100_v63  ;;  %v1799_v53 = vld [vmem:[%s2360_s1 + $0x88] sm:$0xff]   ;;  %p1803_p2 = pneg %p1802_p1  ;;  %p1809_p6 = por %p1808_p5, %p1807_p4 }
  0x44   : > { %v1070_v13 = vrot.slane %v1069_v2, 4  ;;  %v1165_v3 = vsel %vm2126_vm6, %v1528_v17, %v1164_v18  ;;  %v1530_v30 = vrot.slane %v2219_v25, 9  ;;  %v1172_v63 = vrot.slane %v1505_v60, 5 }
  0x45   : > { %1643 = vmatmul.mubr.msk.bf16.vlgmr.msra.gmra.mrb[0].mxu0 %vm346_vm3, %v1493_v33  ;;  %1617 = vmatpush3.bf16.msra.mxu1 %v1789_v20  ;;  %v1168_v20 = vrot.slane %v2197_v31, 5  ;;  %v1061_v23 = vsel %vm2065_vm2, %v1056_v4, %v1060_v12  ;;  %v1531_v29 = vrot.slane %v2222_v44, 9  ;;  %v1176_v31 = vrot.slane %v1507_v8, 5  ;;  %p1810_p7 = pnand %p1809_p6, %p1803_p2 }
  0x46   : > { %1647 = vmatpush3.bf16.msra.mxu0 %v1785_v0  ;;  %1650 = vmatprep.mubr.msk.bf16.mxu0 %vm346_vm3, %v1512_v39  ;;  %v1513_v0 = vcombine.low %v2219_v25, %v2222_v44  ;;  %v1075_v26 = vsel %vm2065_vm2, %v1070_v13, %v1074_v14  ;;  %v1173_v32 = vsel %vm2126_vm6, %v1530_v30, %v1172_v63  ;;  %v1559_v45 = vunpack.c.l.bf16 %v1561_v21 }
  0x47   : > { %1648 = vmatprep.subr.bf16.mxu0 %v1788_v37  ;;  %1622 = vmatprep.subr.bf16.mxu1 %v1793_v50  ;;  %v1169_v27 = vsel %vm2126_vm6, %v1529_v19, %v1168_v20  ;;  %v1523_v11 = vcombine.low %v1061_v23, %v1075_v26  ;;  %v1177_v33 = vsel %vm2126_vm6, %v1531_v29, %v1176_v31  ;;  %v1560_v55 = vunpack.c.h.bf16 %v1561_v21 }
  0x48   : > { %v1536_v28 = vcombine.low %v1165_v3, %v1169_v27  ;;  %v1537_v34 = vcombine.low %v1173_v32, %v1177_v33 }
  0x4a   : > { %1649 = vmatpush3.bf16.msra.mxu0 %v1788_v37 }
  0x4b   : > { %1654 = vmatprep.subr.bf16.mxu0 %v1791_v49 }
  0x4c   : > { %1619 = vmatmul.mubr.msk.bf16.vlgmr.msra.gmra.mrb[0].mxu1 %vm346_vm3, %v1449_v56 }
  0x4d   : > { %1623 = vmatpush3.bf16.msra.mxu1 %v1793_v50  ;;  %1626 = vmatprep.mubr.msk.bf16.mxu1 %vm346_vm3, %v1468_v59  ;;  %v1556_v59 = vunpack.c.h.bf16 %v1554_v43 }
  0x4e   : > { %1624 = vmatprep.subr.bf16.mxu1 %v1795_v57 }
  0x51   : > { %1651 = vmatmul.mubr.msk.bf16.vlgmr.msra.gmra.mrb[0].mxu0 %vm346_vm3, %v1513_v0  ;;  %1625 = vmatpush3.bf16.msra.mxu1 %v1795_v57 }
  0x52   : > { %1655 = vmatpush3.bf16.msra.mxu0 %v1791_v49  ;;  %1658 = vmatprep.mubr.msk.bf16.mxu0 %vm346_vm3, %v1522_v24  ;;  %v1555_v49 = vunpack.c.l.bf16 %v1554_v43 }
  0x53   : > { %1656 = vmatprep.subr.bf16.mxu0 %v1794_v58 }
  0x56   : > { %1657 = vmatpush3.bf16.msra.mxu0 %v1794_v58 }
  0x57   : > { %1662 = vmatprep.subr.bf16.mxu0 %v1797_v15 }
  0x58   : > { %1627 = vmatmul.mubr.msk.bf16.vlgmr.msra.gmra.mrb[0].mxu1 %vm346_vm3, %v1469_v22 }
  0x5d   : > { %1659 = vmatmul.mubr.msk.bf16.vlgmr.msra.gmra.mrb[0].mxu0 %vm346_vm3, %v1523_v11 }
  0x5e   : > { %1663 = vmatpush3.bf16.msra.mxu0 %v1797_v15  ;;  %1666 = vmatprep.mubr.msk.bf16.mxu0 %vm346_vm3, %v1536_v28 }
  0x5f   : > { %1664 = vmatprep.subr.bf16.mxu0 %v1799_v53 }
  0x62   : > { %1665 = vmatpush3.bf16.msra.mxu0 %v1799_v53 }
  0x69   : > { %1667 = vmatmul.mubr.msk.bf16.vlgmr.msra.gmra.mrb[0].mxu0 %vm346_vm3, %v1537_v34 }
 0x12b   : > { %v1628_v36 = vpop.f32.mrb[0].mxu1 }
 0x12c   : > { %v663_v39 = vpop.f32.mrb[1].mxu1 }
 0x12d   : > { %v1629_v37 = vpop.f32.mrb[2].mxu1 }
 0x12e   : > { %v666_v50 = vpop.f32.mrb[3].mxu1 }
 0x13c   : > { %v1668_v40 = vpop.f32.mrb[0].mxu0 }
 0x13d   : > { %v1670_v41 = vadd.f32 %v1668_v40, %v1628_v36  ;;  %v1241_v35 = vpop.f32.mrb[1].mxu0 }
 0x13e   : > { %v1671_v42 = vadd.f32 %v1241_v35, %v663_v39  ;;  %v1669_v25 = vpop.f32.mrb[2].mxu0 }
 0x13f   : > { %v1269_v44 = vadd.f32 %v1670_v41, %v1542_v38  ;;  %v1672_v46 = vadd.f32 %v1669_v25, %v1629_v37  ;;  %v1244_v47 = vpop.f32.mrb[3].mxu0 }
 0x140   : > { %v1267_v48 = vadd.f32 %v1671_v42, %v1542_v38  ;;  %v1673_v51 = vadd.f32 %v1244_v47, %v666_v50 }
 0x141   : > { %v1273_v52 = vmax.f32 %v1269_v44, 0.0  ;;  %v1270_v54 = vadd.f32 %v1672_v46, %v1542_v38 }
 0x142   : > { %v1271_v56 = vmax.f32 %v1267_v48, 0.0  ;;  %v1268_v57 = vadd.f32 %v1673_v51, %v1542_v38 }
 0x143   : > { %v1285_v60 = vadd.f32 %v1559_v45, %v1273_v52  ;;  %v1274_v7 = vmax.f32 %v1270_v54, 0.0 }
 0x144   : > { %v1283_v9 = vadd.f32 %v1555_v49, %v1271_v56  ;;  %v1272_v61 = vmax.f32 %v1268_v57, 0.0 }
 0x145   : > { %1289 = vst.msk [vmem:[%s230_s19 + $0x10] sm:$0xff] %vm346_vm3, %v1285_v60  ;;  %v1286_v62 = vadd.f32 %v1560_v55, %v1274_v7 }
 0x146   : > { %1287 = vst.msk [vmem:[%s230_s19] sm:$0xff] %vm346_vm3, %v1283_v9  ;;  %v1284_v5 = vadd.f32 %v1556_v59, %v1272_v61 }
 0x147   : > { %1290 = vst.msk [vmem:[%s230_s19 + $0x18] sm:$0xff] %vm346_vm3, %v1286_v62 }
 0x148   : > { %1288 = vst.msk [vmem:[%s230_s19 + $0x8] sm:$0xff] %vm346_vm3, %v1284_v5 }
 0x149   : > { %1813 = shalt.err (!%p1810_p7)
}
 0x14a   : > { %s1814_s13 = scalar_lea.hbm %s2298_s6, 512  ;;  %s1818_s14 = scalar_lea.hbm %s2363_s4, 2048 }
 0x14b   : > { %p1815_p9 = scmp.ne.s32.totalorder %s2298_s6, %s1814_s13  ;;  %p1819_p12 = scmp.lt.u32.totalorder %s2298_s6, %s2363_s4 }
 0x14c   : > { %p1820_p13 = scmp.lt.u32.totalorder %s1818_s14, %s1814_s13  ;;  %p1822_p1 = scmp.lt.u32.totalorder %s1814_s13, %s2298_s6 }
 0x14d   : > { %p1816_p10 = pnand %p1815_p9, %p1975_p3 }
 0x14e   : > { %p1821_p0 = por %p1820_p13, %p1819_p12 }
 0x14f   : > { %p1817_p11 = pneg %p1816_p10 }
 0x150   : > { %p1823_p2 = por %p1822_p1, %p1821_p0 }
 0x152   : > { %p1824_p4 = pnand %p1823_p2, %p1817_p11 }
 0x154   : > { %1827 = shalt.err (!%p1824_p4)
}
 0x155   : > { %s1897_s24 = smov 128   ;;  %s1898_s5 = smov 8  }
 0x156   : > { %1703 = dma.vmem_to_hbm [thread:$0]  (%p1975_p3), %s2300_s30, 512, %s2298_s6, %s2307_s8, %s1897_s24, %s1897_s24, %s1898_s5  }
 0x157 PF: > { %p1709_p5 = scmp.ge.s32.totalorder %s1894_s22, 2  ;;  %s1322_s9 = sand.u32 1, %s1866_s15  }
 0x158   : > { %s1323_s10 = scalar_lea.sflag [#allocation3], %s1322_s9 }
 0x159   : > { %p1706_p6 = pnand %p1709_p5, %p1984_p8 }
 0x15b   : > { %1861 = dma.done.wait (!%p1706_p6), %s1323_s10, 512  }
 0x15c   : > { %1863 = vsyncadd (!%p1706_p6), %s1323_s10, 4294966784  ;;  %s17_s22 = sadd.s32 1, %s1894_s22   ;;  %s2370_s15 = smov %s1870_s16 }
 0x15d   : > { %p14_p7 = scmp.ge.s32.totalorder %s17_s22, 6   ;;  %s2371_s16 = smov %s1874_s17 }
 0x15e   : > { %s2372_s17 = smov %s1993_s7  ;;  %s2373_s18 = smov %s1886_s20 }
 0x15f   : > { %s2374_s19 = smov %s1890_s21  ;;  %s2375_s20 = smov %s2378_s25 }
 0x160   : > { %s2376_s21 = smov %s2382_s26  ;;  %16 = sbr.rel (!%p14_p7) target bundleno = 5 (0x5), region = 85 }
 0x167   :  { %1328 = vsyncpa [#allocation3], 1 }
 0x168   :  { %1330 = vsyncpa [#allocation3 + $0x1], 1 }

</bundles_post_ra>
